<compile_context>
chip_gen: v6e
topology: v6e:2x2x1
jax: 0.10.0
libtpu: 0.0.40
codegen_flags: <defaults>
</compile_context>

<pallas_src>
import numpy as np

import jax
import jax.numpy as jnp
from jax.experimental import pallas as pl
from jax.experimental.pallas import tpu as pltpu


# ----------------------------------------------------------------------------
# Constant 0/1 selection matrices (trace-time, numpy -> baked constants)
# ----------------------------------------------------------------------------
def _selection_constants(h, w):
    hh, wh = h // 2, w // 2
    p, hw = hh * wh, h * w
    q = np.arange(p)
    r, c = q // wh, q % wh
    base = (2 * r) * w + (2 * c)          # flat HW index of each 2x2 window origin

    # s4[t]  : (hw, p) gathers pooling / conv-transpose tap t  (di, dj) in {0,1}^2
    # s4t[t] : (p, hw) scatters the same tap back to full resolution
    s4 = np.zeros((4, hw, p), np.float32)
    for t, (di, dj) in enumerate(((0, 0), (0, 1), (1, 0), (1, 1))):
        s4[t, base + di * w + dj, q] = 1.0
    s4t = np.ascontiguousarray(s4.transpose(0, 2, 1))

    # t9[k] : (p, p) exact shift-and-zero-pad for 3x3 conv tap k = ki*3 + kj
    t9 = np.zeros((9, p, p), np.float32)
    for ki in range(3):
        for kj in range(3):
            di, dj = ki - 1, kj - 1
            valid = (r + di >= 0) & (r + di < hh) & (c + dj >= 0) & (c + dj < wh)
            src = q + di * wh + dj
            t9[ki * 3 + kj, src[valid], q[valid]] = 1.0
    return s4, s4t, t9


# ----------------------------------------------------------------------------
# Fused kernel: maxpool -> conv+IN+LReLU -> conv+IN+LReLU -> convT -> concat
# ----------------------------------------------------------------------------
def _make_kernel(cin, cout, p, hw):
    inv_p = 1.0 / p

    def kernel(x_ref, s4_ref, s4t_ref, t9_ref,
               w1_ref, b1_ref, w2_ref, b2_ref, wt_ref, bt_ref, o_ref):
        f32 = jnp.float32
        x = x_ref[...]                                          # (cin, hw) f32

        # -------- MaxPool2d(2, 2): max of the four window taps (exact gathers) -----
        pooled = jnp.dot(x, s4_ref[0], preferred_element_type=f32)
        for t in range(1, 4):
            pooled = jnp.maximum(
                pooled, jnp.dot(x, s4_ref[t], preferred_element_type=f32))

        # -------- Conv2d(3x3, pad=1): 9 x (bf16 channel-mix, exact f32 shift) ------
        def conv3x3(u, wk_ref, b_ref):
            ub = u.astype(jnp.bfloat16)                         # MXU-native inputs
            acc = jnp.zeros((cout, p), f32)
            for k in range(9):
                v = jnp.dot(wk_ref[k], ub, preferred_element_type=f32)      # (cout, p)
                acc = acc + jnp.dot(v, t9_ref[k], preferred_element_type=f32)
            return acc + b_ref[...]

        # -------- InstanceNorm2d (affine=False, eps=1e-5, single pass) + LReLU -----
        def inorm_lrelu(y):
            s1 = jnp.sum(y, axis=1, keepdims=True)
            s2 = jnp.sum(y * y, axis=1, keepdims=True)
            mean = s1 * inv_p
            var = jnp.maximum(s2 * inv_p - mean * mean, 0.0)
            y = (y - mean) * jax.lax.rsqrt(var + 1e-5)
            return jnp.where(y >= 0.0, y, 0.01 * y)

        h1 = inorm_lrelu(conv3x3(pooled, w1_ref, b1_ref))       # (cout, p)
        h2 = inorm_lrelu(conv3x3(h1, w2_ref, b2_ref))           # (cout, p)

        # -------- ConvTranspose2d(2x2, stride 2): channel-mix then exact scatter ---
        h2b = h2.astype(jnp.bfloat16)
        up = jnp.zeros((cin, hw), f32)
        for t in range(4):
            z = jnp.dot(wt_ref[t], h2b, preferred_element_type=f32)         # (cin, p)
            up = up + jnp.dot(z, s4t_ref[t], preferred_element_type=f32)    # (cin, hw)
        up = up + bt_ref[...]

        # -------- skip connection: cat([x, y], dim=1) == channel-offset stores -----
        o_ref[0:cin, :] = x
        o_ref[cin:2 * cin, :] = up

    return kernel


# ----------------------------------------------------------------------------
# Module forward (innermost UnetSkipConnectionBlock, drop_prob=0.0 -> no dropout)
# ----------------------------------------------------------------------------
@jax.jit
def unet_skip_block_forward(x, params):
    w1, b1, w2, b2, wt, bt = params
    n, cin, h, w = x.shape
    cout = w1.shape[0]
    assert h % 2 == 0 and w % 2 == 0, "MaxPool2d(2,2)/ConvTranspose2d(2,2) need even H, W"
    assert cout == 2 * cin, "innermost block requires out_channels == 2 * in_channels"
    assert wt.shape == (2 * cin, cin, 2, 2), wt.shape

    hh, wh = h // 2, w // 2
    p, hw = hh * wh, h * w

    s4_np, s4t_np, t9_np = _selection_constants(h, w)
    s4, s4t, t9 = jnp.asarray(s4_np), jnp.asarray(s4t_np), jnp.asarray(t9_np)

    # weight re-layouts (trace-time glue; contiguous reshapes are free in XLA)
    w1k = jnp.transpose(w1, (2, 3, 0, 1)).reshape(9, cout, cin).astype(jnp.bfloat16)
    w2k = jnp.transpose(w2, (2, 3, 0, 1)).reshape(9, cout, cout).astype(jnp.bfloat16)
    wtk = jnp.transpose(wt, (2, 3, 1, 0)).reshape(4, cin, cout).astype(jnp.bfloat16)
    b1c = b1.reshape(cout, 1).astype(jnp.float32)
    b2c = b2.reshape(cout, 1).astype(jnp.float32)
    btc = bt.reshape(cin, 1).astype(jnp.float32)

    x_flat = x.reshape(n, cin, hw)                       # contiguous -> free reshape

    out = pl.pallas_call(
        _make_kernel(cin, cout, p, hw),
        out_shape=jax.ShapeDtypeStruct((n, 2 * cin, hw), jnp.float32),
        grid=(n,),
        in_specs=[
            pl.BlockSpec((None, cin, hw), lambda i: (i, 0, 0)),      # x (flattened)
            pl.BlockSpec((4, hw, p), lambda i: (0, 0, 0)),           # pooling gathers
            pl.BlockSpec((4, p, hw), lambda i: (0, 0, 0)),           # convT scatters
            pl.BlockSpec((9, p, p), lambda i: (0, 0, 0)),            # 3x3 shift matrices
            pl.BlockSpec((9, cout, cin), lambda i: (0, 0, 0)),       # w1 (per tap)
            pl.BlockSpec((cout, 1), lambda i: (0, 0)),               # b1
            pl.BlockSpec((9, cout, cout), lambda i: (0, 0, 0)),      # w2 (per tap)
            pl.BlockSpec((cout, 1), lambda i: (0, 0)),               # b2
            pl.BlockSpec((4, cin, cout), lambda i: (0, 0, 0)),       # wt (per tap, transposed)
            pl.BlockSpec((cin, 1), lambda i: (0, 0)),                # bt
        ],
        out_specs=pl.BlockSpec((None, 2 * cin, hw), lambda i: (i, 0, 0)),
        compiler_params=pltpu.CompilerParams(dimension_semantics=("parallel",)),
    )(x_flat, s4, s4t, t9, w1k, b1c, w2k, b2c, wtk, btc)

    return out.reshape(n, 2 * cin, h, w)


# ----------------------------------------------------------------------------
# Plain-JAX reference (f32) mirroring the PyTorch module, for a tolerance check
# ----------------------------------------------------------------------------
def _reference_forward(x, params):
    w1, b1, w2, b2, wt, bt = params
    n, cin, h, w = x.shape

    def conv_in_lrelu(y, wgt, bias):
        y = jax.lax.conv_general_dilated(
            y, wgt, window_strides=(1, 1), padding=((1, 1), (1, 1)),
            dimension_numbers=("NCHW", "OIHW", "NCHW"),
            precision=jax.lax.Precision.HIGHEST)
        y = y + bias[None, :, None, None]
        mean = jnp.mean(y, axis=(2, 3), keepdims=True)
        var = jnp.mean((y - mean) ** 2, axis=(2, 3), keepdims=True)
        y = (y - mean) * jax.lax.rsqrt(var + 1e-5)
        return jnp.where(y >= 0, y, 0.01 * y)

    hh, wh = h // 2, w // 2
    y = x.reshape(n, cin, hh, 2, wh, 2).max(axis=(3, 5))        # MaxPool2d(2, 2)
    y = conv_in_lrelu(y, w1, b1)
    y = conv_in_lrelu(y, w2, b2)
    up = jnp.einsum("ncij,cokl->noikjl", y, wt,
                    precision=jax.lax.Precision.HIGHEST).reshape(n, cin, h, w)
    up = up + bt[None, :, None, None]
    return jnp.concatenate([x, up], axis=1)                     # crop is identity here


# ----------------------------------------------------------------------------
if __name__ == "__main__":
    N, Cin, H, W = 2, 4, 16, 16
    Cout = 2 * Cin            # innermost block: out_channels == 2 * in_channels

    key = jax.random.PRNGKey(0)
    ks = jax.random.split(key, 7)
    x = jax.random.normal(ks[0], (N, Cin, H, W), jnp.float32)

    # Deterministic synthetic parameters (shapes follow the PyTorch module).
    w1 = 0.1 * jax.random.normal(ks[1], (Cout, Cin, 3, 3), jnp.float32)
    b1 = 0.1 * jax.random.normal(ks[2], (Cout,), jnp.float32)
    w2 = 0.1 * jax.random.normal(ks[3], (Cout, Cout, 3, 3), jnp.float32)
    b2 = 0.1 * jax.random.normal(ks[4], (Cout,), jnp.float32)
    wt = 0.1 * jax.random.normal(ks[5], (2 * Cin, Cin, 2, 2), jnp.float32)  # ConvTranspose2d
    bt = 0.1 * jax.random.normal(ks[6], (Cin,), jnp.float32)
    params = (w1, b1, w2, b2, wt, bt)

    out = jax.block_until_ready(unet_skip_block_forward(x, params))
    assert out.shape == (N, 2 * Cin, H, W), out.shape
    assert out.dtype == jnp.float32

    ref = jax.block_until_ready(_reference_forward(x, params))
    err = float(jnp.max(jnp.abs(out - ref)))
    assert err < 5e-2, f"max abs error vs reference: {err}"     # bf16 conv matmuls

    print("KERNEL_OK")
</pallas_src>

<mosaic_0001>
module attributes {stable_mosaic.version = 11 : i64} {
  func.func @kernel(%arg0: i32, %arg1: memref<1x4x256xf32, #tpu.memory_space<vmem>>, %arg2: memref<4x256x64xf32, #tpu.memory_space<vmem>>, %arg3: memref<4x64x256xf32, #tpu.memory_space<vmem>>, %arg4: memref<9x64x64xf32, #tpu.memory_space<vmem>>, %arg5: memref<9x8x4xbf16, #tpu.memory_space<vmem>>, %arg6: memref<8x1xf32, #tpu.memory_space<vmem>>, %arg7: memref<9x8x8xbf16, #tpu.memory_space<vmem>>, %arg8: memref<8x1xf32, #tpu.memory_space<vmem>>, %arg9: memref<4x4x8xbf16, #tpu.memory_space<vmem>>, %arg10: memref<4x1xf32, #tpu.memory_space<vmem>>, %arg11: memref<1x8x256xf32, #tpu.memory_space<vmem>>) attributes {dimension_semantics = [#tpu.dimension_semantics<parallel>], iteration_bounds = array<i64: 2>, scalar_prefetch = 0 : i64, scratch_operands = 0 : i64, tpu.core_type = #tpu.core_type<tc>, window_params = [{transform_indices = @transform_0, window_bounds = array<i64: 1, 4, 256>}, {pipeline_mode = #tpu.pipeline_mode<synchronous>, transform_indices = @transform_1, window_bounds = array<i64: 4, 256, 64>}, {pipeline_mode = #tpu.pipeline_mode<synchronous>, transform_indices = @transform_2, window_bounds = array<i64: 4, 64, 256>}, {pipeline_mode = #tpu.pipeline_mode<synchronous>, transform_indices = @transform_3, window_bounds = array<i64: 9, 64, 64>}, {pipeline_mode = #tpu.pipeline_mode<synchronous>, transform_indices = @transform_4, window_bounds = array<i64: 9, 8, 4>}, {pipeline_mode = #tpu.pipeline_mode<synchronous>, transform_indices = @transform_5, window_bounds = array<i64: 8, 1>}, {pipeline_mode = #tpu.pipeline_mode<synchronous>, transform_indices = @transform_6, window_bounds = array<i64: 9, 8, 8>}, {pipeline_mode = #tpu.pipeline_mode<synchronous>, transform_indices = @transform_7, window_bounds = array<i64: 8, 1>}, {pipeline_mode = #tpu.pipeline_mode<synchronous>, transform_indices = @transform_8, window_bounds = array<i64: 4, 4, 8>}, {pipeline_mode = #tpu.pipeline_mode<synchronous>, transform_indices = @transform_9, window_bounds = array<i64: 4, 1>}, {transform_indices = @transform_10, window_bounds = array<i64: 1, 8, 256>}]} {
    %c0 = arith.constant 0 : index
    %c0_0 = arith.constant 0 : index
    %c0_1 = arith.constant 0 : index
    %0 = vector.load %arg1[%c0, %c0_0, %c0_1] : memref<1x4x256xf32, #tpu.memory_space<vmem>>, vector<1x4x256xf32>
    %1 = vector.shape_cast %0 : vector<1x4x256xf32> to vector<4x256xf32>
    %c0_2 = arith.constant 0 : index
    %c0_3 = arith.constant 0 : index
    %c0_4 = arith.constant 0 : index
    %2 = vector.load %arg2[%c0_2, %c0_3, %c0_4] : memref<4x256x64xf32, #tpu.memory_space<vmem>>, vector<1x256x64xf32>
    %3 = vector.shape_cast %2 : vector<1x256x64xf32> to vector<256x64xf32>
    %cst = arith.constant dense<0.000000e+00> : vector<4x64xf32>
    %4 = tpu.matmul %1, %3, %cst {dimension_numbers = #tpu.dot_dimension_numbers<[1], [0], [0], [1], [0, 0, 1, 1], [], []>} : vector<4x256xf32>, vector<256x64xf32>, vector<4x64xf32> -> vector<4x64xf32>
    %c1 = arith.constant 1 : index
    %c0_5 = arith.constant 0 : index
    %c0_6 = arith.constant 0 : index
    %5 = vector.load %arg2[%c1, %c0_5, %c0_6] : memref<4x256x64xf32, #tpu.memory_space<vmem>>, vector<1x256x64xf32>
    %6 = vector.shape_cast %5 : vector<1x256x64xf32> to vector<256x64xf32>
    %cst_7 = arith.constant dense<0.000000e+00> : vector<4x64xf32>
    %7 = tpu.matmul %1, %6, %cst_7 {dimension_numbers = #tpu.dot_dimension_numbers<[1], [0], [0], [1], [0, 0, 1, 1], [], []>} : vector<4x256xf32>, vector<256x64xf32>, vector<4x64xf32> -> vector<4x64xf32>
    %8 = arith.maximumf %4, %7 : vector<4x64xf32>
    %c2 = arith.constant 2 : index
    %c0_8 = arith.constant 0 : index
    %c0_9 = arith.constant 0 : index
    %9 = vector.load %arg2[%c2, %c0_8, %c0_9] : memref<4x256x64xf32, #tpu.memory_space<vmem>>, vector<1x256x64xf32>
    %10 = vector.shape_cast %9 : vector<1x256x64xf32> to vector<256x64xf32>
    %cst_10 = arith.constant dense<0.000000e+00> : vector<4x64xf32>
    %11 = tpu.matmul %1, %10, %cst_10 {dimension_numbers = #tpu.dot_dimension_numbers<[1], [0], [0], [1], [0, 0, 1, 1], [], []>} : vector<4x256xf32>, vector<256x64xf32>, vector<4x64xf32> -> vector<4x64xf32>
    %12 = arith.maximumf %8, %11 : vector<4x64xf32>
    %c3 = arith.constant 3 : index
    %c0_11 = arith.constant 0 : index
    %c0_12 = arith.constant 0 : index
    %13 = vector.load %arg2[%c3, %c0_11, %c0_12] : memref<4x256x64xf32, #tpu.memory_space<vmem>>, vector<1x256x64xf32>
    %14 = vector.shape_cast %13 : vector<1x256x64xf32> to vector<256x64xf32>
    %cst_13 = arith.constant dense<0.000000e+00> : vector<4x64xf32>
    %15 = tpu.matmul %1, %14, %cst_13 {dimension_numbers = #tpu.dot_dimension_numbers<[1], [0], [0], [1], [0, 0, 1, 1], [], []>} : vector<4x256xf32>, vector<256x64xf32>, vector<4x64xf32> -> vector<4x64xf32>
    %16 = arith.maximumf %12, %15 : vector<4x64xf32>
    %17 = arith.truncf %16 : vector<4x64xf32> to vector<4x64xbf16>
    %cst_14 = arith.constant 0.000000e+00 : f32
    %18 = vector.broadcast %cst_14 : f32 to vector<8x64xf32>
    %c0_15 = arith.constant 0 : index
    %c0_16 = arith.constant 0 : index
    %c0_17 = arith.constant 0 : index
    %19 = vector.load %arg5[%c0_15, %c0_16, %c0_17] : memref<9x8x4xbf16, #tpu.memory_space<vmem>>, vector<1x8x4xbf16>
    %20 = vector.shape_cast %19 : vector<1x8x4xbf16> to vector<8x4xbf16>
    %cst_18 = arith.constant dense<0.000000e+00> : vector<8x64xf32>
    %21 = tpu.matmul %20, %17, %cst_18 {dimension_numbers = #tpu.dot_dimension_numbers<[1], [0], [0], [1], [0, 0, 1, 1], [], []>} : vector<8x4xbf16>, vector<4x64xbf16>, vector<8x64xf32> -> vector<8x64xf32>
    %c0_19 = arith.constant 0 : index
    %c0_20 = arith.constant 0 : index
    %c0_21 = arith.constant 0 : index
    %22 = vector.load %arg4[%c0_19, %c0_20, %c0_21] : memref<9x64x64xf32, #tpu.memory_space<vmem>>, vector<1x64x64xf32>
    %23 = vector.shape_cast %22 : vector<1x64x64xf32> to vector<64x64xf32>
    %cst_22 = arith.constant dense<0.000000e+00> : vector<8x64xf32>
    %24 = tpu.matmul %21, %23, %cst_22 {dimension_numbers = #tpu.dot_dimension_numbers<[1], [0], [0], [1], [0, 0, 1, 1], [], []>} : vector<8x64xf32>, vector<64x64xf32>, vector<8x64xf32> -> vector<8x64xf32>
    %25 = arith.addf %18, %24 : vector<8x64xf32>
    %c1_23 = arith.constant 1 : index
    %c0_24 = arith.constant 0 : index
    %c0_25 = arith.constant 0 : index
    %26 = vector.load %arg5[%c1_23, %c0_24, %c0_25] : memref<9x8x4xbf16, #tpu.memory_space<vmem>>, vector<1x8x4xbf16>
    %27 = vector.shape_cast %26 : vector<1x8x4xbf16> to vector<8x4xbf16>
    %cst_26 = arith.constant dense<0.000000e+00> : vector<8x64xf32>
    %28 = tpu.matmul %27, %17, %cst_26 {dimension_numbers = #tpu.dot_dimension_numbers<[1], [0], [0], [1], [0, 0, 1, 1], [], []>} : vector<8x4xbf16>, vector<4x64xbf16>, vector<8x64xf32> -> vector<8x64xf32>
    %c1_27 = arith.constant 1 : index
    %c0_28 = arith.constant 0 : index
    %c0_29 = arith.constant 0 : index
    %29 = vector.load %arg4[%c1_27, %c0_28, %c0_29] : memref<9x64x64xf32, #tpu.memory_space<vmem>>, vector<1x64x64xf32>
    %30 = vector.shape_cast %29 : vector<1x64x64xf32> to vector<64x64xf32>
    %cst_30 = arith.constant dense<0.000000e+00> : vector<8x64xf32>
    %31 = tpu.matmul %28, %30, %cst_30 {dimension_numbers = #tpu.dot_dimension_numbers<[1], [0], [0], [1], [0, 0, 1, 1], [], []>} : vector<8x64xf32>, vector<64x64xf32>, vector<8x64xf32> -> vector<8x64xf32>
    %32 = arith.addf %25, %31 : vector<8x64xf32>
    %c2_31 = arith.constant 2 : index
    %c0_32 = arith.constant 0 : index
    %c0_33 = arith.constant 0 : index
    %33 = vector.load %arg5[%c2_31, %c0_32, %c0_33] : memref<9x8x4xbf16, #tpu.memory_space<vmem>>, vector<1x8x4xbf16>
    %34 = vector.shape_cast %33 : vector<1x8x4xbf16> to vector<8x4xbf16>
    %cst_34 = arith.constant dense<0.000000e+00> : vector<8x64xf32>
    %35 = tpu.matmul %34, %17, %cst_34 {dimension_numbers = #tpu.dot_dimension_numbers<[1], [0], [0], [1], [0, 0, 1, 1], [], []>} : vector<8x4xbf16>, vector<4x64xbf16>, vector<8x64xf32> -> vector<8x64xf32>
    %c2_35 = arith.constant 2 : index
    %c0_36 = arith.constant 0 : index
    %c0_37 = arith.constant 0 : index
    %36 = vector.load %arg4[%c2_35, %c0_36, %c0_37] : memref<9x64x64xf32, #tpu.memory_space<vmem>>, vector<1x64x64xf32>
    %37 = vector.shape_cast %36 : vector<1x64x64xf32> to vector<64x64xf32>
    %cst_38 = arith.constant dense<0.000000e+00> : vector<8x64xf32>
    %38 = tpu.matmul %35, %37, %cst_38 {dimension_numbers = #tpu.dot_dimension_numbers<[1], [0], [0], [1], [0, 0, 1, 1], [], []>} : vector<8x64xf32>, vector<64x64xf32>, vector<8x64xf32> -> vector<8x64xf32>
    %39 = arith.addf %32, %38 : vector<8x64xf32>
    %c3_39 = arith.constant 3 : index
    %c0_40 = arith.constant 0 : index
    %c0_41 = arith.constant 0 : index
    %40 = vector.load %arg5[%c3_39, %c0_40, %c0_41] : memref<9x8x4xbf16, #tpu.memory_space<vmem>>, vector<1x8x4xbf16>
    %41 = vector.shape_cast %40 : vector<1x8x4xbf16> to vector<8x4xbf16>
    %cst_42 = arith.constant dense<0.000000e+00> : vector<8x64xf32>
    %42 = tpu.matmul %41, %17, %cst_42 {dimension_numbers = #tpu.dot_dimension_numbers<[1], [0], [0], [1], [0, 0, 1, 1], [], []>} : vector<8x4xbf16>, vector<4x64xbf16>, vector<8x64xf32> -> vector<8x64xf32>
    %c3_43 = arith.constant 3 : index
    %c0_44 = arith.constant 0 : index
    %c0_45 = arith.constant 0 : index
    %43 = vector.load %arg4[%c3_43, %c0_44, %c0_45] : memref<9x64x64xf32, #tpu.memory_space<vmem>>, vector<1x64x64xf32>
    %44 = vector.shape_cast %43 : vector<1x64x64xf32> to vector<64x64xf32>
    %cst_46 = arith.constant dense<0.000000e+00> : vector<8x64xf32>
    %45 = tpu.matmul %42, %44, %cst_46 {dimension_numbers = #tpu.dot_dimension_numbers<[1], [0], [0], [1], [0, 0, 1, 1], [], []>} : vector<8x64xf32>, vector<64x64xf32>, vector<8x64xf32> -> vector<8x64xf32>
    %46 = arith.addf %39, %45 : vector<8x64xf32>
    %c4 = arith.constant 4 : index
    %c0_47 = arith.constant 0 : index
    %c0_48 = arith.constant 0 : index
    %47 = vector.load %arg5[%c4, %c0_47, %c0_48] : memref<9x8x4xbf16, #tpu.memory_space<vmem>>, vector<1x8x4xbf16>
    %48 = vector.shape_cast %47 : vector<1x8x4xbf16> to vector<8x4xbf16>
    %cst_49 = arith.constant dense<0.000000e+00> : vector<8x64xf32>
    %49 = tpu.matmul %48, %17, %cst_49 {dimension_numbers = #tpu.dot_dimension_numbers<[1], [0], [0], [1], [0, 0, 1, 1], [], []>} : vector<8x4xbf16>, vector<4x64xbf16>, vector<8x64xf32> -> vector<8x64xf32>
    %c4_50 = arith.constant 4 : index
    %c0_51 = arith.constant 0 : index
    %c0_52 = arith.constant 0 : index
    %50 = vector.load %arg4[%c4_50, %c0_51, %c0_52] : memref<9x64x64xf32, #tpu.memory_space<vmem>>, vector<1x64x64xf32>
    %51 = vector.shape_cast %50 : vector<1x64x64xf32> to vector<64x64xf32>
    %cst_53 = arith.constant dense<0.000000e+00> : vector<8x64xf32>
    %52 = tpu.matmul %49, %51, %cst_53 {dimension_numbers = #tpu.dot_dimension_numbers<[1], [0], [0], [1], [0, 0, 1, 1], [], []>} : vector<8x64xf32>, vector<64x64xf32>, vector<8x64xf32> -> vector<8x64xf32>
    %53 = arith.addf %46, %52 : vector<8x64xf32>
    %c5 = arith.constant 5 : index
    %c0_54 = arith.constant 0 : index
    %c0_55 = arith.constant 0 : index
    %54 = vector.load %arg5[%c5, %c0_54, %c0_55] : memref<9x8x4xbf16, #tpu.memory_space<vmem>>, vector<1x8x4xbf16>
    %55 = vector.shape_cast %54 : vector<1x8x4xbf16> to vector<8x4xbf16>
    %cst_56 = arith.constant dense<0.000000e+00> : vector<8x64xf32>
    %56 = tpu.matmul %55, %17, %cst_56 {dimension_numbers = #tpu.dot_dimension_numbers<[1], [0], [0], [1], [0, 0, 1, 1], [], []>} : vector<8x4xbf16>, vector<4x64xbf16>, vector<8x64xf32> -> vector<8x64xf32>
    %c5_57 = arith.constant 5 : index
    %c0_58 = arith.constant 0 : index
    %c0_59 = arith.constant 0 : index
    %57 = vector.load %arg4[%c5_57, %c0_58, %c0_59] : memref<9x64x64xf32, #tpu.memory_space<vmem>>, vector<1x64x64xf32>
    %58 = vector.shape_cast %57 : vector<1x64x64xf32> to vector<64x64xf32>
    %cst_60 = arith.constant dense<0.000000e+00> : vector<8x64xf32>
    %59 = tpu.matmul %56, %58, %cst_60 {dimension_numbers = #tpu.dot_dimension_numbers<[1], [0], [0], [1], [0, 0, 1, 1], [], []>} : vector<8x64xf32>, vector<64x64xf32>, vector<8x64xf32> -> vector<8x64xf32>
    %60 = arith.addf %53, %59 : vector<8x64xf32>
    %c6 = arith.constant 6 : index
    %c0_61 = arith.constant 0 : index
    %c0_62 = arith.constant 0 : index
    %61 = vector.load %arg5[%c6, %c0_61, %c0_62] : memref<9x8x4xbf16, #tpu.memory_space<vmem>>, vector<1x8x4xbf16>
    %62 = vector.shape_cast %61 : vector<1x8x4xbf16> to vector<8x4xbf16>
    %cst_63 = arith.constant dense<0.000000e+00> : vector<8x64xf32>
    %63 = tpu.matmul %62, %17, %cst_63 {dimension_numbers = #tpu.dot_dimension_numbers<[1], [0], [0], [1], [0, 0, 1, 1], [], []>} : vector<8x4xbf16>, vector<4x64xbf16>, vector<8x64xf32> -> vector<8x64xf32>
    %c6_64 = arith.constant 6 : index
    %c0_65 = arith.constant 0 : index
    %c0_66 = arith.constant 0 : index
    %64 = vector.load %arg4[%c6_64, %c0_65, %c0_66] : memref<9x64x64xf32, #tpu.memory_space<vmem>>, vector<1x64x64xf32>
    %65 = vector.shape_cast %64 : vector<1x64x64xf32> to vector<64x64xf32>
    %cst_67 = arith.constant dense<0.000000e+00> : vector<8x64xf32>
    %66 = tpu.matmul %63, %65, %cst_67 {dimension_numbers = #tpu.dot_dimension_numbers<[1], [0], [0], [1], [0, 0, 1, 1], [], []>} : vector<8x64xf32>, vector<64x64xf32>, vector<8x64xf32> -> vector<8x64xf32>
    %67 = arith.addf %60, %66 : vector<8x64xf32>
    %c7 = arith.constant 7 : index
    %c0_68 = arith.constant 0 : index
    %c0_69 = arith.constant 0 : index
    %68 = vector.load %arg5[%c7, %c0_68, %c0_69] : memref<9x8x4xbf16, #tpu.memory_space<vmem>>, vector<1x8x4xbf16>
    %69 = vector.shape_cast %68 : vector<1x8x4xbf16> to vector<8x4xbf16>
    %cst_70 = arith.constant dense<0.000000e+00> : vector<8x64xf32>
    %70 = tpu.matmul %69, %17, %cst_70 {dimension_numbers = #tpu.dot_dimension_numbers<[1], [0], [0], [1], [0, 0, 1, 1], [], []>} : vector<8x4xbf16>, vector<4x64xbf16>, vector<8x64xf32> -> vector<8x64xf32>
    %c7_71 = arith.constant 7 : index
    %c0_72 = arith.constant 0 : index
    %c0_73 = arith.constant 0 : index
    %71 = vector.load %arg4[%c7_71, %c0_72, %c0_73] : memref<9x64x64xf32, #tpu.memory_space<vmem>>, vector<1x64x64xf32>
    %72 = vector.shape_cast %71 : vector<1x64x64xf32> to vector<64x64xf32>
    %cst_74 = arith.constant dense<0.000000e+00> : vector<8x64xf32>
    %73 = tpu.matmul %70, %72, %cst_74 {dimension_numbers = #tpu.dot_dimension_numbers<[1], [0], [0], [1], [0, 0, 1, 1], [], []>} : vector<8x64xf32>, vector<64x64xf32>, vector<8x64xf32> -> vector<8x64xf32>
    %74 = arith.addf %67, %73 : vector<8x64xf32>
    %c8 = arith.constant 8 : index
    %c0_75 = arith.constant 0 : index
    %c0_76 = arith.constant 0 : index
    %75 = vector.load %arg5[%c8, %c0_75, %c0_76] : memref<9x8x4xbf16, #tpu.memory_space<vmem>>, vector<1x8x4xbf16>
    %76 = vector.shape_cast %75 : vector<1x8x4xbf16> to vector<8x4xbf16>
    %cst_77 = arith.constant dense<0.000000e+00> : vector<8x64xf32>
    %77 = tpu.matmul %76, %17, %cst_77 {dimension_numbers = #tpu.dot_dimension_numbers<[1], [0], [0], [1], [0, 0, 1, 1], [], []>} : vector<8x4xbf16>, vector<4x64xbf16>, vector<8x64xf32> -> vector<8x64xf32>
    %c8_78 = arith.constant 8 : index
    %c0_79 = arith.constant 0 : index
    %c0_80 = arith.constant 0 : index
    %78 = vector.load %arg4[%c8_78, %c0_79, %c0_80] : memref<9x64x64xf32, #tpu.memory_space<vmem>>, vector<1x64x64xf32>
    %79 = vector.shape_cast %78 : vector<1x64x64xf32> to vector<64x64xf32>
    %cst_81 = arith.constant dense<0.000000e+00> : vector<8x64xf32>
    %80 = tpu.matmul %77, %79, %cst_81 {dimension_numbers = #tpu.dot_dimension_numbers<[1], [0], [0], [1], [0, 0, 1, 1], [], []>} : vector<8x64xf32>, vector<64x64xf32>, vector<8x64xf32> -> vector<8x64xf32>
    %81 = arith.addf %74, %80 : vector<8x64xf32>
    %c0_82 = arith.constant 0 : index
    %c0_83 = arith.constant 0 : index
    %82 = vector.load %arg6[%c0_82, %c0_83] : memref<8x1xf32, #tpu.memory_space<vmem>>, vector<8x1xf32>
    %83 = vector.broadcast %82 : vector<8x1xf32> to vector<8x64xf32>
    %84 = arith.addf %81, %83 : vector<8x64xf32>
    %cst_84 = arith.constant dense<0.000000e+00> : vector<8xf32>
    %85 = vector.multi_reduction <add>, %84, %cst_84 [1] : vector<8x64xf32> to vector<8xf32>
    %86 = vector.shape_cast %85 : vector<8xf32> to vector<8x1xf32>
    %87 = arith.mulf %84, %84 : vector<8x64xf32>
    %cst_85 = arith.constant dense<0.000000e+00> : vector<8xf32>
    %88 = vector.multi_reduction <add>, %87, %cst_85 [1] : vector<8x64xf32> to vector<8xf32>
    %89 = vector.shape_cast %88 : vector<8xf32> to vector<8x1xf32>
    %cst_86 = arith.constant 1.562500e-02 : f32
    %90 = vector.broadcast %cst_86 : f32 to vector<8x1xf32>
    %91 = arith.mulf %86, %90 : vector<8x1xf32>
    %cst_87 = arith.constant 1.562500e-02 : f32
    %92 = vector.broadcast %cst_87 : f32 to vector<8x1xf32>
    %93 = arith.mulf %89, %92 : vector<8x1xf32>
    %94 = arith.mulf %91, %91 : vector<8x1xf32>
    %95 = arith.subf %93, %94 : vector<8x1xf32>
    %cst_88 = arith.constant 0.000000e+00 : f32
    %96 = vector.broadcast %cst_88 : f32 to vector<8x1xf32>
    %97 = arith.maximumf %95, %96 : vector<8x1xf32>
    %98 = vector.broadcast %91 : vector<8x1xf32> to vector<8x64xf32>
    %99 = arith.subf %84, %98 : vector<8x64xf32>
    %cst_89 = arith.constant 9.99999974E-6 : f32
    %100 = vector.broadcast %cst_89 : f32 to vector<8x1xf32>
    %101 = arith.addf %97, %100 : vector<8x1xf32>
    %102 = math.rsqrt %101 : vector<8x1xf32>
    %103 = vector.broadcast %102 : vector<8x1xf32> to vector<8x64xf32>
    %104 = arith.mulf %99, %103 : vector<8x64xf32>
    %cst_90 = arith.constant 0.000000e+00 : f32
    %105 = vector.broadcast %cst_90 : f32 to vector<8x64xf32>
    %106 = arith.cmpf oge, %104, %105 : vector<8x64xf32>
    %cst_91 = arith.constant 0.00999999977 : f32
    %107 = vector.broadcast %cst_91 : f32 to vector<8x64xf32>
    %108 = arith.mulf %107, %104 : vector<8x64xf32>
    %109 = arith.select %106, %104, %108 : vector<8x64xi1>, vector<8x64xf32>
    %110 = arith.truncf %109 : vector<8x64xf32> to vector<8x64xbf16>
    %cst_92 = arith.constant 0.000000e+00 : f32
    %111 = vector.broadcast %cst_92 : f32 to vector<8x64xf32>
    %c0_93 = arith.constant 0 : index
    %c0_94 = arith.constant 0 : index
    %c0_95 = arith.constant 0 : index
    %112 = vector.load %arg7[%c0_93, %c0_94, %c0_95] : memref<9x8x8xbf16, #tpu.memory_space<vmem>>, vector<1x8x8xbf16>
    %113 = vector.shape_cast %112 : vector<1x8x8xbf16> to vector<8x8xbf16>
    %cst_96 = arith.constant dense<0.000000e+00> : vector<8x64xf32>
    %114 = tpu.matmul %113, %110, %cst_96 {dimension_numbers = #tpu.dot_dimension_numbers<[1], [0], [0], [1], [0, 0, 1, 1], [], []>} : vector<8x8xbf16>, vector<8x64xbf16>, vector<8x64xf32> -> vector<8x64xf32>
    %c0_97 = arith.constant 0 : index
    %c0_98 = arith.constant 0 : index
    %c0_99 = arith.constant 0 : index
    %115 = vector.load %arg4[%c0_97, %c0_98, %c0_99] : memref<9x64x64xf32, #tpu.memory_space<vmem>>, vector<1x64x64xf32>
    %116 = vector.shape_cast %115 : vector<1x64x64xf32> to vector<64x64xf32>
    %cst_100 = arith.constant dense<0.000000e+00> : vector<8x64xf32>
    %117 = tpu.matmul %114, %116, %cst_100 {dimension_numbers = #tpu.dot_dimension_numbers<[1], [0], [0], [1], [0, 0, 1, 1], [], []>} : vector<8x64xf32>, vector<64x64xf32>, vector<8x64xf32> -> vector<8x64xf32>
    %118 = arith.addf %111, %117 : vector<8x64xf32>
    %c1_101 = arith.constant 1 : index
    %c0_102 = arith.constant 0 : index
    %c0_103 = arith.constant 0 : index
    %119 = vector.load %arg7[%c1_101, %c0_102, %c0_103] : memref<9x8x8xbf16, #tpu.memory_space<vmem>>, vector<1x8x8xbf16>
    %120 = vector.shape_cast %119 : vector<1x8x8xbf16> to vector<8x8xbf16>
    %cst_104 = arith.constant dense<0.000000e+00> : vector<8x64xf32>
    %121 = tpu.matmul %120, %110, %cst_104 {dimension_numbers = #tpu.dot_dimension_numbers<[1], [0], [0], [1], [0, 0, 1, 1], [], []>} : vector<8x8xbf16>, vector<8x64xbf16>, vector<8x64xf32> -> vector<8x64xf32>
    %c1_105 = arith.constant 1 : index
    %c0_106 = arith.constant 0 : index
    %c0_107 = arith.constant 0 : index
    %122 = vector.load %arg4[%c1_105, %c0_106, %c0_107] : memref<9x64x64xf32, #tpu.memory_space<vmem>>, vector<1x64x64xf32>
    %123 = vector.shape_cast %122 : vector<1x64x64xf32> to vector<64x64xf32>
    %cst_108 = arith.constant dense<0.000000e+00> : vector<8x64xf32>
    %124 = tpu.matmul %121, %123, %cst_108 {dimension_numbers = #tpu.dot_dimension_numbers<[1], [0], [0], [1], [0, 0, 1, 1], [], []>} : vector<8x64xf32>, vector<64x64xf32>, vector<8x64xf32> -> vector<8x64xf32>
    %125 = arith.addf %118, %124 : vector<8x64xf32>
    %c2_109 = arith.constant 2 : index
    %c0_110 = arith.constant 0 : index
    %c0_111 = arith.constant 0 : index
    %126 = vector.load %arg7[%c2_109, %c0_110, %c0_111] : memref<9x8x8xbf16, #tpu.memory_space<vmem>>, vector<1x8x8xbf16>
    %127 = vector.shape_cast %126 : vector<1x8x8xbf16> to vector<8x8xbf16>
    %cst_112 = arith.constant dense<0.000000e+00> : vector<8x64xf32>
    %128 = tpu.matmul %127, %110, %cst_112 {dimension_numbers = #tpu.dot_dimension_numbers<[1], [0], [0], [1], [0, 0, 1, 1], [], []>} : vector<8x8xbf16>, vector<8x64xbf16>, vector<8x64xf32> -> vector<8x64xf32>
    %c2_113 = arith.constant 2 : index
    %c0_114 = arith.constant 0 : index
    %c0_115 = arith.constant 0 : index
    %129 = vector.load %arg4[%c2_113, %c0_114, %c0_115] : memref<9x64x64xf32, #tpu.memory_space<vmem>>, vector<1x64x64xf32>
    %130 = vector.shape_cast %129 : vector<1x64x64xf32> to vector<64x64xf32>
    %cst_116 = arith.constant dense<0.000000e+00> : vector<8x64xf32>
    %131 = tpu.matmul %128, %130, %cst_116 {dimension_numbers = #tpu.dot_dimension_numbers<[1], [0], [0], [1], [0, 0, 1, 1], [], []>} : vector<8x64xf32>, vector<64x64xf32>, vector<8x64xf32> -> vector<8x64xf32>
    %132 = arith.addf %125, %131 : vector<8x64xf32>
    %c3_117 = arith.constant 3 : index
    %c0_118 = arith.constant 0 : index
    %c0_119 = arith.constant 0 : index
    %133 = vector.load %arg7[%c3_117, %c0_118, %c0_119] : memref<9x8x8xbf16, #tpu.memory_space<vmem>>, vector<1x8x8xbf16>
    %134 = vector.shape_cast %133 : vector<1x8x8xbf16> to vector<8x8xbf16>
    %cst_120 = arith.constant dense<0.000000e+00> : vector<8x64xf32>
    %135 = tpu.matmul %134, %110, %cst_120 {dimension_numbers = #tpu.dot_dimension_numbers<[1], [0], [0], [1], [0, 0, 1, 1], [], []>} : vector<8x8xbf16>, vector<8x64xbf16>, vector<8x64xf32> -> vector<8x64xf32>
    %c3_121 = arith.constant 3 : index
    %c0_122 = arith.constant 0 : index
    %c0_123 = arith.constant 0 : index
    %136 = vector.load %arg4[%c3_121, %c0_122, %c0_123] : memref<9x64x64xf32, #tpu.memory_space<vmem>>, vector<1x64x64xf32>
    %137 = vector.shape_cast %136 : vector<1x64x64xf32> to vector<64x64xf32>
    %cst_124 = arith.constant dense<0.000000e+00> : vector<8x64xf32>
    %138 = tpu.matmul %135, %137, %cst_124 {dimension_numbers = #tpu.dot_dimension_numbers<[1], [0], [0], [1], [0, 0, 1, 1], [], []>} : vector<8x64xf32>, vector<64x64xf32>, vector<8x64xf32> -> vector<8x64xf32>
    %139 = arith.addf %132, %138 : vector<8x64xf32>
    %c4_125 = arith.constant 4 : index
    %c0_126 = arith.constant 0 : index
    %c0_127 = arith.constant 0 : index
    %140 = vector.load %arg7[%c4_125, %c0_126, %c0_127] : memref<9x8x8xbf16, #tpu.memory_space<vmem>>, vector<1x8x8xbf16>
    %141 = vector.shape_cast %140 : vector<1x8x8xbf16> to vector<8x8xbf16>
    %cst_128 = arith.constant dense<0.000000e+00> : vector<8x64xf32>
    %142 = tpu.matmul %141, %110, %cst_128 {dimension_numbers = #tpu.dot_dimension_numbers<[1], [0], [0], [1], [0, 0, 1, 1], [], []>} : vector<8x8xbf16>, vector<8x64xbf16>, vector<8x64xf32> -> vector<8x64xf32>
    %c4_129 = arith.constant 4 : index
    %c0_130 = arith.constant 0 : index
    %c0_131 = arith.constant 0 : index
    %143 = vector.load %arg4[%c4_129, %c0_130, %c0_131] : memref<9x64x64xf32, #tpu.memory_space<vmem>>, vector<1x64x64xf32>
    %144 = vector.shape_cast %143 : vector<1x64x64xf32> to vector<64x64xf32>
    %cst_132 = arith.constant dense<0.000000e+00> : vector<8x64xf32>
    %145 = tpu.matmul %142, %144, %cst_132 {dimension_numbers = #tpu.dot_dimension_numbers<[1], [0], [0], [1], [0, 0, 1, 1], [], []>} : vector<8x64xf32>, vector<64x64xf32>, vector<8x64xf32> -> vector<8x64xf32>
    %146 = arith.addf %139, %145 : vector<8x64xf32>
    %c5_133 = arith.constant 5 : index
    %c0_134 = arith.constant 0 : index
    %c0_135 = arith.constant 0 : index
    %147 = vector.load %arg7[%c5_133, %c0_134, %c0_135] : memref<9x8x8xbf16, #tpu.memory_space<vmem>>, vector<1x8x8xbf16>
    %148 = vector.shape_cast %147 : vector<1x8x8xbf16> to vector<8x8xbf16>
    %cst_136 = arith.constant dense<0.000000e+00> : vector<8x64xf32>
    %149 = tpu.matmul %148, %110, %cst_136 {dimension_numbers = #tpu.dot_dimension_numbers<[1], [0], [0], [1], [0, 0, 1, 1], [], []>} : vector<8x8xbf16>, vector<8x64xbf16>, vector<8x64xf32> -> vector<8x64xf32>
    %c5_137 = arith.constant 5 : index
    %c0_138 = arith.constant 0 : index
    %c0_139 = arith.constant 0 : index
    %150 = vector.load %arg4[%c5_137, %c0_138, %c0_139] : memref<9x64x64xf32, #tpu.memory_space<vmem>>, vector<1x64x64xf32>
    %151 = vector.shape_cast %150 : vector<1x64x64xf32> to vector<64x64xf32>
    %cst_140 = arith.constant dense<0.000000e+00> : vector<8x64xf32>
    %152 = tpu.matmul %149, %151, %cst_140 {dimension_numbers = #tpu.dot_dimension_numbers<[1], [0], [0], [1], [0, 0, 1, 1], [], []>} : vector<8x64xf32>, vector<64x64xf32>, vector<8x64xf32> -> vector<8x64xf32>
    %153 = arith.addf %146, %152 : vector<8x64xf32>
    %c6_141 = arith.constant 6 : index
    %c0_142 = arith.constant 0 : index
    %c0_143 = arith.constant 0 : index
    %154 = vector.load %arg7[%c6_141, %c0_142, %c0_143] : memref<9x8x8xbf16, #tpu.memory_space<vmem>>, vector<1x8x8xbf16>
    %155 = vector.shape_cast %154 : vector<1x8x8xbf16> to vector<8x8xbf16>
    %cst_144 = arith.constant dense<0.000000e+00> : vector<8x64xf32>
    %156 = tpu.matmul %155, %110, %cst_144 {dimension_numbers = #tpu.dot_dimension_numbers<[1], [0], [0], [1], [0, 0, 1, 1], [], []>} : vector<8x8xbf16>, vector<8x64xbf16>, vector<8x64xf32> -> vector<8x64xf32>
    %c6_145 = arith.constant 6 : index
    %c0_146 = arith.constant 0 : index
    %c0_147 = arith.constant 0 : index
    %157 = vector.load %arg4[%c6_145, %c0_146, %c0_147] : memref<9x64x64xf32, #tpu.memory_space<vmem>>, vector<1x64x64xf32>
    %158 = vector.shape_cast %157 : vector<1x64x64xf32> to vector<64x64xf32>
    %cst_148 = arith.constant dense<0.000000e+00> : vector<8x64xf32>
    %159 = tpu.matmul %156, %158, %cst_148 {dimension_numbers = #tpu.dot_dimension_numbers<[1], [0], [0], [1], [0, 0, 1, 1], [], []>} : vector<8x64xf32>, vector<64x64xf32>, vector<8x64xf32> -> vector<8x64xf32>
    %160 = arith.addf %153, %159 : vector<8x64xf32>
    %c7_149 = arith.constant 7 : index
    %c0_150 = arith.constant 0 : index
    %c0_151 = arith.constant 0 : index
    %161 = vector.load %arg7[%c7_149, %c0_150, %c0_151] : memref<9x8x8xbf16, #tpu.memory_space<vmem>>, vector<1x8x8xbf16>
    %162 = vector.shape_cast %161 : vector<1x8x8xbf16> to vector<8x8xbf16>
    %cst_152 = arith.constant dense<0.000000e+00> : vector<8x64xf32>
    %163 = tpu.matmul %162, %110, %cst_152 {dimension_numbers = #tpu.dot_dimension_numbers<[1], [0], [0], [1], [0, 0, 1, 1], [], []>} : vector<8x8xbf16>, vector<8x64xbf16>, vector<8x64xf32> -> vector<8x64xf32>
    %c7_153 = arith.constant 7 : index
    %c0_154 = arith.constant 0 : index
    %c0_155 = arith.constant 0 : index
    %164 = vector.load %arg4[%c7_153, %c0_154, %c0_155] : memref<9x64x64xf32, #tpu.memory_space<vmem>>, vector<1x64x64xf32>
    %165 = vector.shape_cast %164 : vector<1x64x64xf32> to vector<64x64xf32>
    %cst_156 = arith.constant dense<0.000000e+00> : vector<8x64xf32>
    %166 = tpu.matmul %163, %165, %cst_156 {dimension_numbers = #tpu.dot_dimension_numbers<[1], [0], [0], [1], [0, 0, 1, 1], [], []>} : vector<8x64xf32>, vector<64x64xf32>, vector<8x64xf32> -> vector<8x64xf32>
    %167 = arith.addf %160, %166 : vector<8x64xf32>
    %c8_157 = arith.constant 8 : index
    %c0_158 = arith.constant 0 : index
    %c0_159 = arith.constant 0 : index
    %168 = vector.load %arg7[%c8_157, %c0_158, %c0_159] : memref<9x8x8xbf16, #tpu.memory_space<vmem>>, vector<1x8x8xbf16>
    %169 = vector.shape_cast %168 : vector<1x8x8xbf16> to vector<8x8xbf16>
    %cst_160 = arith.constant dense<0.000000e+00> : vector<8x64xf32>
    %170 = tpu.matmul %169, %110, %cst_160 {dimension_numbers = #tpu.dot_dimension_numbers<[1], [0], [0], [1], [0, 0, 1, 1], [], []>} : vector<8x8xbf16>, vector<8x64xbf16>, vector<8x64xf32> -> vector<8x64xf32>
    %c8_161 = arith.constant 8 : index
    %c0_162 = arith.constant 0 : index
    %c0_163 = arith.constant 0 : index
    %171 = vector.load %arg4[%c8_161, %c0_162, %c0_163] : memref<9x64x64xf32, #tpu.memory_space<vmem>>, vector<1x64x64xf32>
    %172 = vector.shape_cast %171 : vector<1x64x64xf32> to vector<64x64xf32>
    %cst_164 = arith.constant dense<0.000000e+00> : vector<8x64xf32>
    %173 = tpu.matmul %170, %172, %cst_164 {dimension_numbers = #tpu.dot_dimension_numbers<[1], [0], [0], [1], [0, 0, 1, 1], [], []>} : vector<8x64xf32>, vector<64x64xf32>, vector<8x64xf32> -> vector<8x64xf32>
    %174 = arith.addf %167, %173 : vector<8x64xf32>
    %c0_165 = arith.constant 0 : index
    %c0_166 = arith.constant 0 : index
    %175 = vector.load %arg8[%c0_165, %c0_166] : memref<8x1xf32, #tpu.memory_space<vmem>>, vector<8x1xf32>
    %176 = vector.broadcast %175 : vector<8x1xf32> to vector<8x64xf32>
    %177 = arith.addf %174, %176 : vector<8x64xf32>
    %cst_167 = arith.constant dense<0.000000e+00> : vector<8xf32>
    %178 = vector.multi_reduction <add>, %177, %cst_167 [1] : vector<8x64xf32> to vector<8xf32>
    %179 = vector.shape_cast %178 : vector<8xf32> to vector<8x1xf32>
    %180 = arith.mulf %177, %177 : vector<8x64xf32>
    %cst_168 = arith.constant dense<0.000000e+00> : vector<8xf32>
    %181 = vector.multi_reduction <add>, %180, %cst_168 [1] : vector<8x64xf32> to vector<8xf32>
    %182 = vector.shape_cast %181 : vector<8xf32> to vector<8x1xf32>
    %cst_169 = arith.constant 1.562500e-02 : f32
    %183 = vector.broadcast %cst_169 : f32 to vector<8x1xf32>
    %184 = arith.mulf %179, %183 : vector<8x1xf32>
    %cst_170 = arith.constant 1.562500e-02 : f32
    %185 = vector.broadcast %cst_170 : f32 to vector<8x1xf32>
    %186 = arith.mulf %182, %185 : vector<8x1xf32>
    %187 = arith.mulf %184, %184 : vector<8x1xf32>
    %188 = arith.subf %186, %187 : vector<8x1xf32>
    %cst_171 = arith.constant 0.000000e+00 : f32
    %189 = vector.broadcast %cst_171 : f32 to vector<8x1xf32>
    %190 = arith.maximumf %188, %189 : vector<8x1xf32>
    %191 = vector.broadcast %184 : vector<8x1xf32> to vector<8x64xf32>
    %192 = arith.subf %177, %191 : vector<8x64xf32>
    %cst_172 = arith.constant 9.99999974E-6 : f32
    %193 = vector.broadcast %cst_172 : f32 to vector<8x1xf32>
    %194 = arith.addf %190, %193 : vector<8x1xf32>
    %195 = math.rsqrt %194 : vector<8x1xf32>
    %196 = vector.broadcast %195 : vector<8x1xf32> to vector<8x64xf32>
    %197 = arith.mulf %192, %196 : vector<8x64xf32>
    %cst_173 = arith.constant 0.000000e+00 : f32
    %198 = vector.broadcast %cst_173 : f32 to vector<8x64xf32>
    %199 = arith.cmpf oge, %197, %198 : vector<8x64xf32>
    %cst_174 = arith.constant 0.00999999977 : f32
    %200 = vector.broadcast %cst_174 : f32 to vector<8x64xf32>
    %201 = arith.mulf %200, %197 : vector<8x64xf32>
    %202 = arith.select %199, %197, %201 : vector<8x64xi1>, vector<8x64xf32>
    %203 = arith.truncf %202 : vector<8x64xf32> to vector<8x64xbf16>
    %cst_175 = arith.constant 0.000000e+00 : f32
    %204 = vector.broadcast %cst_175 : f32 to vector<4x256xf32>
    %c0_176 = arith.constant 0 : index
    %c0_177 = arith.constant 0 : index
    %c0_178 = arith.constant 0 : index
    %205 = vector.load %arg9[%c0_176, %c0_177, %c0_178] : memref<4x4x8xbf16, #tpu.memory_space<vmem>>, vector<1x4x8xbf16>
    %206 = vector.shape_cast %205 : vector<1x4x8xbf16> to vector<4x8xbf16>
    %cst_179 = arith.constant dense<0.000000e+00> : vector<4x64xf32>
    %207 = tpu.matmul %206, %203, %cst_179 {dimension_numbers = #tpu.dot_dimension_numbers<[1], [0], [0], [1], [0, 0, 1, 1], [], []>} : vector<4x8xbf16>, vector<8x64xbf16>, vector<4x64xf32> -> vector<4x64xf32>
    %c0_180 = arith.constant 0 : index
    %c0_181 = arith.constant 0 : index
    %c0_182 = arith.constant 0 : index
    %208 = vector.load %arg3[%c0_180, %c0_181, %c0_182] : memref<4x64x256xf32, #tpu.memory_space<vmem>>, vector<1x64x256xf32>
    %209 = vector.shape_cast %208 : vector<1x64x256xf32> to vector<64x256xf32>
    %cst_183 = arith.constant dense<0.000000e+00> : vector<4x256xf32>
    %210 = tpu.matmul %207, %209, %cst_183 {dimension_numbers = #tpu.dot_dimension_numbers<[1], [0], [0], [1], [0, 0, 1, 1], [], []>} : vector<4x64xf32>, vector<64x256xf32>, vector<4x256xf32> -> vector<4x256xf32>
    %211 = arith.addf %204, %210 : vector<4x256xf32>
    %c1_184 = arith.constant 1 : index
    %c0_185 = arith.constant 0 : index
    %c0_186 = arith.constant 0 : index
    %212 = vector.load %arg9[%c1_184, %c0_185, %c0_186] : memref<4x4x8xbf16, #tpu.memory_space<vmem>>, vector<1x4x8xbf16>
    %213 = vector.shape_cast %212 : vector<1x4x8xbf16> to vector<4x8xbf16>
    %cst_187 = arith.constant dense<0.000000e+00> : vector<4x64xf32>
    %214 = tpu.matmul %213, %203, %cst_187 {dimension_numbers = #tpu.dot_dimension_numbers<[1], [0], [0], [1], [0, 0, 1, 1], [], []>} : vector<4x8xbf16>, vector<8x64xbf16>, vector<4x64xf32> -> vector<4x64xf32>
    %c1_188 = arith.constant 1 : index
    %c0_189 = arith.constant 0 : index
    %c0_190 = arith.constant 0 : index
    %215 = vector.load %arg3[%c1_188, %c0_189, %c0_190] : memref<4x64x256xf32, #tpu.memory_space<vmem>>, vector<1x64x256xf32>
    %216 = vector.shape_cast %215 : vector<1x64x256xf32> to vector<64x256xf32>
    %cst_191 = arith.constant dense<0.000000e+00> : vector<4x256xf32>
    %217 = tpu.matmul %214, %216, %cst_191 {dimension_numbers = #tpu.dot_dimension_numbers<[1], [0], [0], [1], [0, 0, 1, 1], [], []>} : vector<4x64xf32>, vector<64x256xf32>, vector<4x256xf32> -> vector<4x256xf32>
    %218 = arith.addf %211, %217 : vector<4x256xf32>
    %c2_192 = arith.constant 2 : index
    %c0_193 = arith.constant 0 : index
    %c0_194 = arith.constant 0 : index
    %219 = vector.load %arg9[%c2_192, %c0_193, %c0_194] : memref<4x4x8xbf16, #tpu.memory_space<vmem>>, vector<1x4x8xbf16>
    %220 = vector.shape_cast %219 : vector<1x4x8xbf16> to vector<4x8xbf16>
    %cst_195 = arith.constant dense<0.000000e+00> : vector<4x64xf32>
    %221 = tpu.matmul %220, %203, %cst_195 {dimension_numbers = #tpu.dot_dimension_numbers<[1], [0], [0], [1], [0, 0, 1, 1], [], []>} : vector<4x8xbf16>, vector<8x64xbf16>, vector<4x64xf32> -> vector<4x64xf32>
    %c2_196 = arith.constant 2 : index
    %c0_197 = arith.constant 0 : index
    %c0_198 = arith.constant 0 : index
    %222 = vector.load %arg3[%c2_196, %c0_197, %c0_198] : memref<4x64x256xf32, #tpu.memory_space<vmem>>, vector<1x64x256xf32>
    %223 = vector.shape_cast %222 : vector<1x64x256xf32> to vector<64x256xf32>
    %cst_199 = arith.constant dense<0.000000e+00> : vector<4x256xf32>
    %224 = tpu.matmul %221, %223, %cst_199 {dimension_numbers = #tpu.dot_dimension_numbers<[1], [0], [0], [1], [0, 0, 1, 1], [], []>} : vector<4x64xf32>, vector<64x256xf32>, vector<4x256xf32> -> vector<4x256xf32>
    %225 = arith.addf %218, %224 : vector<4x256xf32>
    %c3_200 = arith.constant 3 : index
    %c0_201 = arith.constant 0 : index
    %c0_202 = arith.constant 0 : index
    %226 = vector.load %arg9[%c3_200, %c0_201, %c0_202] : memref<4x4x8xbf16, #tpu.memory_space<vmem>>, vector<1x4x8xbf16>
    %227 = vector.shape_cast %226 : vector<1x4x8xbf16> to vector<4x8xbf16>
    %cst_203 = arith.constant dense<0.000000e+00> : vector<4x64xf32>
    %228 = tpu.matmul %227, %203, %cst_203 {dimension_numbers = #tpu.dot_dimension_numbers<[1], [0], [0], [1], [0, 0, 1, 1], [], []>} : vector<4x8xbf16>, vector<8x64xbf16>, vector<4x64xf32> -> vector<4x64xf32>
    %c3_204 = arith.constant 3 : index
    %c0_205 = arith.constant 0 : index
    %c0_206 = arith.constant 0 : index
    %229 = vector.load %arg3[%c3_204, %c0_205, %c0_206] : memref<4x64x256xf32, #tpu.memory_space<vmem>>, vector<1x64x256xf32>
    %230 = vector.shape_cast %229 : vector<1x64x256xf32> to vector<64x256xf32>
    %cst_207 = arith.constant dense<0.000000e+00> : vector<4x256xf32>
    %231 = tpu.matmul %228, %230, %cst_207 {dimension_numbers = #tpu.dot_dimension_numbers<[1], [0], [0], [1], [0, 0, 1, 1], [], []>} : vector<4x64xf32>, vector<64x256xf32>, vector<4x256xf32> -> vector<4x256xf32>
    %232 = arith.addf %225, %231 : vector<4x256xf32>
    %c0_208 = arith.constant 0 : index
    %c0_209 = arith.constant 0 : index
    %233 = vector.load %arg10[%c0_208, %c0_209] : memref<4x1xf32, #tpu.memory_space<vmem>>, vector<4x1xf32>
    %234 = vector.broadcast %233 : vector<4x1xf32> to vector<4x256xf32>
    %235 = arith.addf %232, %234 : vector<4x256xf32>
    %c0_210 = arith.constant 0 : index
    %c0_211 = arith.constant 0 : index
    %c0_212 = arith.constant 0 : index
    %236 = vector.load %arg11[%c0_210, %c0_211, %c0_212] : memref<1x8x256xf32, #tpu.memory_space<vmem>>, vector<1x4x256xf32>
    %237 = vector.shape_cast %236 : vector<1x4x256xf32> to vector<4x256xf32>
    %238 = vector.shape_cast %1 : vector<4x256xf32> to vector<1x4x256xf32>
    tpu.vector_store %arg11[%c0_210, %c0_211, %c0_212], %238 {strides = array<i32>} : memref<1x8x256xf32, #tpu.memory_space<vmem>>, vector<1x4x256xf32>,
    %c0_213 = arith.constant 0 : index
    %c4_214 = arith.constant 4 : index
    %c0_215 = arith.constant 0 : index
    %239 = vector.load %arg11[%c0_213, %c4_214, %c0_215] : memref<1x8x256xf32, #tpu.memory_space<vmem>>, vector<1x4x256xf32>
    %240 = vector.shape_cast %239 : vector<1x4x256xf32> to vector<4x256xf32>
    %241 = vector.shape_cast %235 : vector<4x256xf32> to vector<1x4x256xf32>
    tpu.vector_store %arg11[%c0_213, %c4_214, %c0_215], %241 {strides = array<i32>} : memref<1x8x256xf32, #tpu.memory_space<vmem>>, vector<1x4x256xf32>,
    return
  }
  func.func @transform_0(%arg0: i32) -> (i32, i32, i32) {
    %c0_i32 = arith.constant 0 : i32
    %c0_i32_0 = arith.constant 0 : i32
    %c0_i32_1 = arith.constant 0 : i32
    return %arg0, %c0_i32, %c0_i32_0 : i32, i32, i32
  }
  func.func @transform_1(%arg0: i32) -> (i32, i32, i32) {
    %c0_i32 = arith.constant 0 : i32
    %c0_i32_0 = arith.constant 0 : i32
    %c0_i32_1 = arith.constant 0 : i32
    %c0_i32_2 = arith.constant 0 : i32
    return %c0_i32, %c0_i32_0, %c0_i32_1 : i32, i32, i32
  }
  func.func @transform_2(%arg0: i32) -> (i32, i32, i32) {
    %c0_i32 = arith.constant 0 : i32
    %c0_i32_0 = arith.constant 0 : i32
    %c0_i32_1 = arith.constant 0 : i32
    %c0_i32_2 = arith.constant 0 : i32
    return %c0_i32, %c0_i32_0, %c0_i32_1 : i32, i32, i32
  }
  func.func @transform_3(%arg0: i32) -> (i32, i32, i32) {
    %c0_i32 = arith.constant 0 : i32
    %c0_i32_0 = arith.constant 0 : i32
    %c0_i32_1 = arith.constant 0 : i32
    %c0_i32_2 = arith.constant 0 : i32
    return %c0_i32, %c0_i32_0, %c0_i32_1 : i32, i32, i32
  }
  func.func @transform_4(%arg0: i32) -> (i32, i32, i32) {
    %c0_i32 = arith.constant 0 : i32
    %c0_i32_0 = arith.constant 0 : i32
    %c0_i32_1 = arith.constant 0 : i32
    %c0_i32_2 = arith.constant 0 : i32
    return %c0_i32, %c0_i32_0, %c0_i32_1 : i32, i32, i32
  }
  func.func @transform_5(%arg0: i32) -> (i32, i32) {
    %c0_i32 = arith.constant 0 : i32
    %c0_i32_0 = arith.constant 0 : i32
    %c0_i32_1 = arith.constant 0 : i32
    return %c0_i32, %c0_i32_0 : i32, i32
  }
  func.func @transform_6(%arg0: i32) -> (i32, i32, i32) {
    %c0_i32 = arith.constant 0 : i32
    %c0_i32_0 = arith.constant 0 : i32
    %c0_i32_1 = arith.constant 0 : i32
    %c0_i32_2 = arith.constant 0 : i32
    return %c0_i32, %c0_i32_0, %c0_i32_1 : i32, i32, i32
  }
  func.func @transform_7(%arg0: i32) -> (i32, i32) {
    %c0_i32 = arith.constant 0 : i32
    %c0_i32_0 = arith.constant 0 : i32
    %c0_i32_1 = arith.constant 0 : i32
    return %c0_i32, %c0_i32_0 : i32, i32
  }
  func.func @transform_8(%arg0: i32) -> (i32, i32, i32) {
    %c0_i32 = arith.constant 0 : i32
    %c0_i32_0 = arith.constant 0 : i32
    %c0_i32_1 = arith.constant 0 : i32
    %c0_i32_2 = arith.constant 0 : i32
    return %c0_i32, %c0_i32_0, %c0_i32_1 : i32, i32, i32
  }
  func.func @transform_9(%arg0: i32) -> (i32, i32) {
    %c0_i32 = arith.constant 0 : i32
    %c0_i32_0 = arith.constant 0 : i32
    %c0_i32_1 = arith.constant 0 : i32
    return %c0_i32, %c0_i32_0 : i32, i32
  }
  func.func @transform_10(%arg0: i32) -> (i32, i32, i32) {
    %c0_i32 = arith.constant 0 : i32
    %c0_i32_0 = arith.constant 0 : i32
    %c0_i32_1 = arith.constant 0 : i32
    return %arg0, %c0_i32, %c0_i32_0 : i32, i32, i32
  }
}

</mosaic_0001>

<bundles_post_ra>
// kernel: unet_skip_block_forward.1
= control target key start
LH: loop header
LB: loop body
LE: loop exit
PB: predicated region body
PF: predicated region fallthrough
CT: control target
= control target key end

     0   :  { %15 = vsyncpa [#allocation3], 0  ;;  %s5671_s0 = inlined_call_operand.vmem [shape: f32[2,4,256], index: 0, kind: input, shape index: {}]   ;;  %s5672_s1 = inlined_call_operand.hbm [shape: f32[4,256,64], index: 1, kind: input, shape index: {}]   ;;  %s5673_s2 = inlined_call_operand.hbm [shape: f32[4,64,256], index: 2, kind: input, shape index: {}]   ;;  %s5674_s3 = inlined_call_operand.hbm [shape: f32[9,64,64], index: 3, kind: input, shape index: {}]   ;;  %s5675_s4 = inlined_call_operand.vmem [shape: bf16[9,8,4], index: 4, kind: input, shape index: {}]   ;;  %s5676_s5 = inlined_call_operand.vmem [shape: f32[8,1], index: 5, kind: input, shape index: {}]   ;;  %s5677_s6 = inlined_call_operand.vmem [shape: bf16[9,8,8], index: 6, kind: input, shape index: {}]   ;;  %s5678_s7 = inlined_call_operand.vmem [shape: f32[8,1], index: 7, kind: input, shape index: {}]   ;;  %s5679_s8 = inlined_call_operand.vmem [shape: bf16[4,4,8], index: 8, kind: input, shape index: {}]   ;;  %s5680_s9 = inlined_call_operand.vmem [shape: f32[4,1], index: 9, kind: input, shape index: {}]   ;;  %s5681_s10 = inlined_call_operand.vmem [shape: f32[2,8,256], index: 10, kind: output, shape index: {}]  }
   0x1   :  { %16 = vsyncpa [#allocation5], 0  ;;  %s4872_s13 = smov 0  }
   0x2 LB: > { %s4807_s14 = smov [#allocation4]   ;;  %s4878_s16 = sadd.s32 4294967295, %s4805_s13   ;;  %s4805_s13 = sphi %s4872_s13, %s22_s13  }
   0x3   : > { %s293_s15 = sshll.u32 %s4807_s14, 4  ;;  %p3760_p0 = scmp.ge.s32.totalorder %s4805_s13, 1  ;;  %s294_s15 = int_to_ptr.vmem [resolvable:$true] %s293_s15 }
   0x4   : > { %p268_p1 = scmp.lt.s32.totalorder %s4805_s13, 3  ;;  %p4682_p2 = scmp.eq.s32.totalorder %s4878_s16, 0 }
   0x5   : > { %s4808_s18 = smov [#allocation2]   ;;  %s4809_s21 = smov [#allocation6]  }
   0x6   : > { %p4883_p3 = pnand %p3760_p0, %p268_p1  ;;  %s280_s19 = sshll.u32 %s4808_s18, 4  ;;  %s4889_s19 = int_to_ptr.vmem [resolvable:$true] %s280_s19 }
   0x7   : > { %s4897_s22 = sshll.u32 %s4809_s21, 4  ;;  %s4724_s23 = scalar_lea.vmem %s294_s15, 8192  ;;  %s307_s22 = int_to_ptr.vmem [resolvable:$true] %s4897_s22 }
   0x8   : > { %p4672_p4 = pneg %p4883_p3  ;;  %p4725_p7 = scmp.ne.s32.totalorder %s294_s15, %s4724_s23 }
   0x9   : > { %p4732_p10 = scmp.lt.s32.totalorder %s294_s15, %s294_s15  ;;  %p4733_p11 = scmp.lt.s32.totalorder %s4724_s23, %s4724_s23 }
   0xa   : > { %p4893_p5 = pnand %p4682_p2, %p4672_p4 }
   0xb   : > { %p4734_p12 = por %p4733_p11, %p4732_p10 }
   0xc   : > { %p4715_p6 = pneg %p4893_p5 }
   0xe   : > { %p4727_p8 = pnand %p4725_p7, %p4715_p6 }
  0x10   : > { %p4728_p9 = pneg %p4727_p8 }
  0x12   : > { %p4735_p13 = pnand %p4734_p12, %p4728_p9 }
  0x14   : > { %4738 = shalt.err (!%p4735_p13)
}
  0x15   : > { %s4810_s24 = smov 256   ;;  %s4811_s25 = smov 16  }
  0x16   : > { %4678 = dma.hbm_to_vmem [thread:$0]  (!%p4893_p5), %s5673_s2, 8192, %s294_s15, [#allocation5], %s4810_s24, %s4810_s24, %s4811_s25  }
  0x17   : > { %s4750_s28 = scalar_lea.vmem %s4889_s19, 16384  ;;  %p4758_p7 = scmp.lt.s32.totalorder %s4889_s19, %s4889_s19 }
  0x18   : > { %p4751_p0 = scmp.ne.s32.totalorder %s4889_s19, %s4750_s28  ;;  %p4759_p8 = scmp.lt.s32.totalorder %s4750_s28, %s4750_s28 }
  0x1a   : > { %p4753_p1 = pnand %p4751_p0, %p4715_p6  ;;  %p4760_p9 = por %p4759_p8, %p4758_p7 }
  0x1c   : > { %p4754_p4 = pneg %p4753_p1 }
  0x1e   : > { %p4761_p10 = pnand %p4760_p9, %p4754_p4 }
  0x20   : > { %4764 = shalt.err (!%p4761_p10)
}
  0x21   : > { %s4812_s29 = smov 128   ;;  %s4813_s30 = smov 8  }
  0x22   : > { %4675 = dma.hbm_to_vmem [thread:$0]  (!%p4893_p5), %s5672_s1, 16384, %s4889_s19, [#allocation3], %s4812_s29, %s4812_s29, %s4813_s30  }
  0x23   : > { %s4776_s14 = scalar_lea.vmem %s307_s22, 9216  ;;  %p4784_p0 = scmp.lt.s32.totalorder %s307_s22, %s307_s22 }
  0x24   : > { %p4777_p11 = scmp.ne.s32.totalorder %s307_s22, %s4776_s14  ;;  %p4785_p1 = scmp.lt.s32.totalorder %s4776_s14, %s4776_s14 }
  0x26   : > { %p4779_p12 = pnand %p4777_p11, %p4715_p6  ;;  %p4786_p4 = por %p4785_p1, %p4784_p0 }
  0x28   : > { %p4780_p13 = pneg %p4779_p12 }
  0x2a   : > { %p4787_p7 = pnand %p4786_p4, %p4780_p13 }
  0x2c   : > { %4790 = shalt.err (!%p4787_p7)
}
  0x2d   : > { %4681 = dma.hbm_to_vmem [thread:$0]  (!%p4893_p5), %s5674_s3, 9216, %s307_s22, [#allocation5], %s4812_s29, %s4812_s29, %s4813_s30  }
  0x2e   : > { %348 = sbr.rel (%p4883_p3) target bundleno = 3650 (0xe42), region = 60 }
  0x33   : > { %4796 = dma.done.wait (%p4682_p2), [#allocation3], 16384  }
  0x34   : > { %4798 = vsyncadd (%p4682_p2), [#allocation3], 4294950912 }
  0x35   : > { %4800 = dma.done.wait (%p4682_p2), [#allocation5], 17408  }
  0x36   : > { %4802 = vsyncadd (%p4682_p2), [#allocation5], 4294949888  ;;  %v437_v0 = vld [vmem:[#allocation2 + $0xf8] sm:$0xff]  ;;  %v436_v4 = vld [vmem:[#allocation2 + $0xf0] sm:$0xff]  ;;  %p394_p2 = scmp.lt.s32.totalorder %s4878_s16, 1  ;;  %vm4815_vm0 = vmmov 0  }
  0x37   : > { %v543_v1 = vld [vmem:[#allocation2 + $0x1f8] sm:$0xff]  ;;  %3840 = vmatprep.subr.mxu0 %v437_v0  ;;  %v542_v5 = vld [vmem:[#allocation2 + $0x1f0] sm:$0xff]  ;;  %v435_v8 = vld [vmem:[#allocation2 + $0xe8] sm:$0xff]  ;;  %vm829_vm1 = vcmask 1041408   ;;  %vm825_vm2 = vcmask 31744   ;;  %vm935_vm3 = vcmask 523264  }
  0x38   : > { %v421_v2 = vld [vmem:[#allocation2 + $0x78] sm:$0xff]  ;;  %3875 = vmatprep.subr.mxu1 %v543_v1  ;;  %v420_v6 = vld [vmem:[#allocation2 + $0x70] sm:$0xff]  ;;  %v541_v9 = vld [vmem:[#allocation2 + $0x1e8] sm:$0xff]  ;;  %s5754_s16 = smov (!%p394_p2, %s4878_s16), 1  ;;  %vm2010_vm5 = vcmask 1043456   ;;  %vm2006_vm6 = vcmask 64512  }
  0x39   : > { %v527_v3 = vld [vmem:[#allocation2 + $0x178] sm:$0xff]  ;;  %3841 = vmatpush3.msra.mxu0 %v421_v2  ;;  %v526_v7 = vld [vmem:[#allocation2 + $0x170] sm:$0xff]  ;;  %v419_v10 = vld [vmem:[#allocation2 + $0x68] sm:$0xff]  ;;  %s3838_s17 = sshll.u32 %s5754_s16, 3 }
  0x3a   : > { %3876 = vmatpush3.msra.mxu1 %v527_v3  ;;  %3842 = vmatprep.subr.mxu0 %v436_v4  ;;  %v525_v11 = vld [vmem:[#allocation2 + $0x168] sm:$0xff]  ;;  %v434_v12 = vld [vmem:[#allocation2 + $0xe0] sm:$0xff]  ;;  %v433_v16 = vld [vmem:[#allocation2 + $0xd8] sm:$0xff]  ;;  %s398_s21 = scalar_lea.vmem %s5671_s0, %s3838_s17  ;;  %s3839_s17 = sshll.u32 %s5754_s16, 4 }
  0x3b   : > { %3877 = vmatprep.subr.mxu1 %v542_v5  ;;  %3843 = vmatpush3.msra.mxu0 %v420_v6  ;;  %v540_v13 = vld [vmem:[#allocation2 + $0x1e0] sm:$0xff]  ;;  %v539_v17 = vld [vmem:[#allocation2 + $0x1d8] sm:$0xff]  ;;  %v432_v20 = vld [vmem:[#allocation2 + $0xd0] sm:$0xff] }
  0x3c   : > { %3878 = vmatpush3.msra.mxu1 %v526_v7  ;;  %3844 = vmatprep.subr.mxu0 %v435_v8  ;;  %v418_v14 = vld [vmem:[#allocation2 + $0x60] sm:$0xff]  ;;  %v417_v18 = vld [vmem:[#allocation2 + $0x58] sm:$0xff]  ;;  %v538_v21 = vld [vmem:[#allocation2 + $0x1d0] sm:$0xff] }
  0x3d   : > { %3879 = vmatprep.subr.mxu1 %v541_v9  ;;  %v524_v15 = vld [vmem:[#allocation2 + $0x160] sm:$0xff]  ;;  %3845 = vmatpush3.msra.mxu0 %v419_v10  ;;  %v523_v19 = vld [vmem:[#allocation2 + $0x158] sm:$0xff]  ;;  %v416_v22 = vld [vmem:[#allocation2 + $0x50] sm:$0xff] }
  0x3e   : > { %3880 = vmatpush3.msra.mxu1 %v525_v11  ;;  %3846 = vmatprep.subr.mxu0 %v434_v12  ;;  %v522_v23 = vld [vmem:[#allocation2 + $0x150] sm:$0xff]  ;;  %v431_v24 = vld [vmem:[#allocation2 + $0xc8] sm:$0xff]  ;;  %v430_v28 = vld [vmem:[#allocation2 + $0xc0] sm:$0xff] }
  0x3f   : > { %3881 = vmatprep.subr.mxu1 %v540_v13  ;;  %3847 = vmatpush3.msra.mxu0 %v418_v14  ;;  %v537_v25 = vld [vmem:[#allocation2 + $0x1c8] sm:$0xff]  ;;  %v536_v29 = vld [vmem:[#allocation2 + $0x1c0] sm:$0xff]  ;;  %v429_v32 = vld [vmem:[#allocation2 + $0xb8] sm:$0xff] }
  0x40   : > { %3882 = vmatpush3.msra.mxu1 %v524_v15  ;;  %3848 = vmatprep.subr.mxu0 %v433_v16  ;;  %v415_v26 = vld [vmem:[#allocation2 + $0x48] sm:$0xff]  ;;  %v414_v30 = vld [vmem:[#allocation2 + $0x40] sm:$0xff]  ;;  %v535_v33 = vld [vmem:[#allocation2 + $0x1b8] sm:$0xff] }
  0x41   : > { %3883 = vmatprep.subr.mxu1 %v539_v17  ;;  %3849 = vmatpush3.msra.mxu0 %v417_v18  ;;  %v521_v27 = vld [vmem:[#allocation2 + $0x148] sm:$0xff]  ;;  %v520_v31 = vld [vmem:[#allocation2 + $0x140] sm:$0xff]  ;;  %v413_v34 = vld [vmem:[#allocation2 + $0x38] sm:$0xff] }
  0x42   : > { %3884 = vmatpush3.msra.mxu1 %v523_v19  ;;  %3850 = vmatprep.subr.mxu0 %v432_v20  ;;  %v519_v35 = vld [vmem:[#allocation2 + $0x138] sm:$0xff]  ;;  %v428_v36 = vld [vmem:[#allocation2 + $0xb0] sm:$0xff]  ;;  %v427_v40 = vld [vmem:[#allocation2 + $0xa8] sm:$0xff] }
  0x43   : > { %3885 = vmatprep.subr.mxu1 %v538_v21  ;;  %3851 = vmatpush3.msra.mxu0 %v416_v22  ;;  %v534_v37 = vld [vmem:[#allocation2 + $0x1b0] sm:$0xff]  ;;  %v533_v41 = vld [vmem:[#allocation2 + $0x1a8] sm:$0xff]  ;;  %v426_v44 = vld [vmem:[#allocation2 + $0xa0] sm:$0xff] }
  0x44   : > { %3886 = vmatpush3.msra.mxu1 %v522_v23  ;;  %3852 = vmatprep.subr.mxu0 %v431_v24  ;;  %v412_v38 = vld [vmem:[#allocation2 + $0x30] sm:$0xff]  ;;  %v411_v42 = vld [vmem:[#allocation2 + $0x28] sm:$0xff]  ;;  %v532_v45 = vld [vmem:[#allocation2 + $0x1a0] sm:$0xff] }
  0x45   : > { %3887 = vmatprep.subr.mxu1 %v537_v25  ;;  %3853 = vmatpush3.msra.mxu0 %v415_v26  ;;  %v518_v39 = vld [vmem:[#allocation2 + $0x130] sm:$0xff]  ;;  %v517_v43 = vld [vmem:[#allocation2 + $0x128] sm:$0xff]  ;;  %v410_v46 = vld [vmem:[#allocation2 + $0x20] sm:$0xff] }
  0x46   : > { %3888 = vmatpush3.msra.mxu1 %v521_v27  ;;  %3854 = vmatprep.subr.mxu0 %v430_v28  ;;  %v516_v47 = vld [vmem:[#allocation2 + $0x120] sm:$0xff]  ;;  %v425_v48 = vld [vmem:[#allocation2 + $0x98] sm:$0xff]  ;;  %v424_v52 = vld [vmem:[#allocation2 + $0x90] sm:$0xff] }
  0x47   : > { %3889 = vmatprep.subr.mxu1 %v536_v29  ;;  %3855 = vmatpush3.msra.mxu0 %v414_v30  ;;  %v531_v49 = vld [vmem:[#allocation2 + $0x198] sm:$0xff]  ;;  %v530_v53 = vld [vmem:[#allocation2 + $0x190] sm:$0xff]  ;;  %v4951_v56 = vld [vmem:[%s398_s21] sm:$0xff]  ;;  %s403_s21 = scalar_lea.vmem %s5681_s10, %s3839_s17 }
  0x48   : > { %3890 = vmatpush3.msra.mxu1 %v520_v31  ;;  %3856 = vmatprep.subr.mxu0 %v429_v32  ;;  %v409_v50 = vld [vmem:[#allocation2 + $0x18] sm:$0xff]  ;;  %v408_v54 = vld [vmem:[#allocation2 + $0x10] sm:$0xff]  ;;  %5707 = vst [vmem:[#allocation9_spill] sm:$0xff] %v4951_v56  ;;  %v423_v57 = vld [vmem:[#allocation2 + $0x88] sm:$0xff]  ;;  %v4955_v63 = vcombine.high %v4951_v56, %v4951_v56 }
  0x49   : > { %3891 = vmatprep.subr.mxu1 %v535_v33  ;;  %3857 = vmatpush3.msra.mxu0 %v413_v34  ;;  %v515_v51 = vld [vmem:[#allocation2 + $0x118] sm:$0xff]  ;;  %v514_v55 = vld [vmem:[#allocation2 + $0x110] sm:$0xff]  ;;  %v529_v58 = vld [vmem:[#allocation2 + $0x188] sm:$0xff] }
  0x4a   : > { %3892 = vmatpush3.msra.mxu1 %v519_v35  ;;  %3858 = vmatprep.subr.mxu0 %v428_v36  ;;  %v407_v59 = vld [vmem:[#allocation2 + $0x8] sm:$0xff]  ;;  %v422_v61 = vld [vmem:[#allocation2 + $0x80] sm:$0xff]  ;;  %5708 = vst [vmem:[#allocation10_spill] sm:$0xff] %v4955_v63  ;;  %v647_v2 = vld [vmem:[#allocation2 + $0x2f8] sm:$0xff] }
  0x4b   : > { %3893 = vmatprep.subr.mxu1 %v534_v37  ;;  %3859 = vmatpush3.msra.mxu0 %v412_v38  ;;  %v513_v60 = vld [vmem:[#allocation2 + $0x108] sm:$0xff]  ;;  %v528_v62 = vld [vmem:[#allocation2 + $0x180] sm:$0xff]  ;;  %v751_v3 = vld [vmem:[#allocation2 + $0x3f8] sm:$0xff] }
  0x4c   : > { %3894 = vmatpush3.msra.mxu1 %v518_v39  ;;  %3860 = vmatprep.subr.mxu0 %v427_v40  ;;  %v406_v0 = vld [vmem:[#allocation2] sm:$0xff]  ;;  %v631_v4 = vld [vmem:[#allocation2 + $0x278] sm:$0xff]  ;;  %v646_v6 = vld [vmem:[#allocation2 + $0x2f0] sm:$0xff] }
  0x4d   : > { %3895 = vmatprep.subr.mxu1 %v533_v41  ;;  %3861 = vmatpush3.msra.mxu0 %v411_v42  ;;  %v512_v1 = vld [vmem:[#allocation2 + $0x100] sm:$0xff]  ;;  %v735_v5 = vld [vmem:[#allocation2 + $0x378] sm:$0xff]  ;;  %v750_v7 = vld [vmem:[#allocation2 + $0x3f0] sm:$0xff] }
  0x4e   : > { %3896 = vmatpush3.msra.mxu1 %v517_v43  ;;  %3862 = vmatprep.subr.mxu0 %v426_v44  ;;  %v630_v8 = vld [vmem:[#allocation2 + $0x270] sm:$0xff]  ;;  %v645_v10 = vld [vmem:[#allocation2 + $0x2e8] sm:$0xff]  ;;  %v644_v14 = vld [vmem:[#allocation2 + $0x2e0] sm:$0xff] }
  0x4f   : > { %3897 = vmatprep.subr.mxu1 %v532_v45  ;;  %3863 = vmatpush3.msra.mxu0 %v410_v46  ;;  %v734_v9 = vld [vmem:[#allocation2 + $0x370] sm:$0xff]  ;;  %v749_v11 = vld [vmem:[#allocation2 + $0x3e8] sm:$0xff]  ;;  %v748_v15 = vld [vmem:[#allocation2 + $0x3e0] sm:$0xff] }
  0x50   : > { %3898 = vmatpush3.msra.mxu1 %v516_v47  ;;  %3864 = vmatprep.subr.mxu0 %v425_v48  ;;  %v629_v12 = vld [vmem:[#allocation2 + $0x268] sm:$0xff]  ;;  %v628_v16 = vld [vmem:[#allocation2 + $0x260] sm:$0xff]  ;;  %v643_v18 = vld [vmem:[#allocation2 + $0x2d8] sm:$0xff] }
  0x51   : > { %3899 = vmatprep.subr.mxu1 %v531_v49  ;;  %3865 = vmatpush3.msra.mxu0 %v409_v50  ;;  %v733_v13 = vld [vmem:[#allocation2 + $0x368] sm:$0xff]  ;;  %v732_v17 = vld [vmem:[#allocation2 + $0x360] sm:$0xff]  ;;  %v747_v19 = vld [vmem:[#allocation2 + $0x3d8] sm:$0xff] }
  0x52   : > { %3900 = vmatpush3.msra.mxu1 %v515_v51  ;;  %3866 = vmatprep.subr.mxu0 %v424_v52  ;;  %v627_v20 = vld [vmem:[#allocation2 + $0x258] sm:$0xff]  ;;  %v642_v22 = vld [vmem:[#allocation2 + $0x2d0] sm:$0xff]  ;;  %v641_v26 = vld [vmem:[#allocation2 + $0x2c8] sm:$0xff] }
  0x53   : > { %3901 = vmatprep.subr.mxu1 %v530_v53  ;;  %3867 = vmatpush3.msra.mxu0 %v408_v54  ;;  %v731_v21 = vld [vmem:[#allocation2 + $0x358] sm:$0xff]  ;;  %v746_v23 = vld [vmem:[#allocation2 + $0x3d0] sm:$0xff]  ;;  %v745_v27 = vld [vmem:[#allocation2 + $0x3c8] sm:$0xff] }
  0x54   : > { %3902 = vmatpush3.msra.mxu1 %v514_v55  ;;  %3868 = vmatprep.subr.mxu0 %v423_v57  ;;  %v626_v24 = vld [vmem:[#allocation2 + $0x250] sm:$0xff]  ;;  %v625_v28 = vld [vmem:[#allocation2 + $0x248] sm:$0xff]  ;;  %v640_v30 = vld [vmem:[#allocation2 + $0x2c0] sm:$0xff] }
  0x55   : > { %3903 = vmatprep.subr.mxu1 %v529_v58  ;;  %3869 = vmatpush3.msra.mxu0 %v407_v59  ;;  %v730_v25 = vld [vmem:[#allocation2 + $0x350] sm:$0xff]  ;;  %v729_v29 = vld [vmem:[#allocation2 + $0x348] sm:$0xff]  ;;  %v744_v31 = vld [vmem:[#allocation2 + $0x3c0] sm:$0xff] }
  0x56   : > { %3904 = vmatpush3.msra.mxu1 %v513_v60  ;;  %3870 = vmatprep.subr.mxu0 %v422_v61  ;;  %v624_v32 = vld [vmem:[#allocation2 + $0x240] sm:$0xff]  ;;  %v639_v34 = vld [vmem:[#allocation2 + $0x2b8] sm:$0xff]  ;;  %v638_v38 = vld [vmem:[#allocation2 + $0x2b0] sm:$0xff] }
  0x57   : > { %3905 = vmatprep.subr.mxu1 %v528_v62  ;;  %3871 = vmatpush3.msra.mxu0 %v406_v0  ;;  %v728_v33 = vld [vmem:[#allocation2 + $0x340] sm:$0xff]  ;;  %v743_v35 = vld [vmem:[#allocation2 + $0x3b8] sm:$0xff]  ;;  %v742_v39 = vld [vmem:[#allocation2 + $0x3b0] sm:$0xff] }
  0x58   : > { %505 = vmatprep.mubr.f32.mxu0 %v4955_v63  ;;  %3906 = vmatpush3.msra.mxu1 %v512_v1  ;;  %v623_v36 = vld [vmem:[#allocation2 + $0x238] sm:$0xff]  ;;  %v622_v40 = vld [vmem:[#allocation2 + $0x230] sm:$0xff]  ;;  %v637_v42 = vld [vmem:[#allocation2 + $0x2a8] sm:$0xff] }
  0x59   : > { %608 = vmatprep.mubr.f32.mxu1 %v4955_v63  ;;  %506 = vmatmul.mubr.f32.vlgmr.msra.gmra.mxu0 %v4951_v56  ;;  %v727_v37 = vld [vmem:[#allocation2 + $0x338] sm:$0xff]  ;;  %v726_v41 = vld [vmem:[#allocation2 + $0x330] sm:$0xff]  ;;  %v741_v43 = vld [vmem:[#allocation2 + $0x3a8] sm:$0xff] }
  0x5a   : > { %609 = vmatmul.mubr.f32.vlgmr.msra.gmra.mxu1 %v4951_v56  ;;  %3910 = vmatprep.subr.mxu0 %v647_v2  ;;  %v621_v44 = vld [vmem:[#allocation2 + $0x228] sm:$0xff]  ;;  %v636_v46 = vld [vmem:[#allocation2 + $0x2a0] sm:$0xff]  ;;  %v635_v50 = vld [vmem:[#allocation2 + $0x298] sm:$0xff] }
  0x5b   : > { %3945 = vmatprep.subr.mxu1 %v751_v3  ;;  %3911 = vmatpush3.msra.mxu0 %v631_v4  ;;  %v725_v45 = vld [vmem:[#allocation2 + $0x328] sm:$0xff]  ;;  %v740_v47 = vld [vmem:[#allocation2 + $0x3a0] sm:$0xff]  ;;  %v739_v51 = vld [vmem:[#allocation2 + $0x398] sm:$0xff]  ;;  %v4814_v4 = vmov 0.0  }
  0x5c   : > { %3946 = vmatpush3.msra.mxu1 %v735_v5  ;;  %3912 = vmatprep.subr.mxu0 %v646_v6  ;;  %v620_v48 = vld [vmem:[#allocation2 + $0x220] sm:$0xff]  ;;  %v619_v52 = vld [vmem:[#allocation2 + $0x218] sm:$0xff]  ;;  %v634_v54 = vld [vmem:[#allocation2 + $0x290] sm:$0xff] }
  0x5d   : > { %3947 = vmatprep.subr.mxu1 %v750_v7  ;;  %3913 = vmatpush3.msra.mxu0 %v630_v8  ;;  %v724_v49 = vld [vmem:[#allocation2 + $0x320] sm:$0xff]  ;;  %v723_v53 = vld [vmem:[#allocation2 + $0x318] sm:$0xff]  ;;  %v738_v55 = vld [vmem:[#allocation2 + $0x390] sm:$0xff] }
  0x5e   : > { %3948 = vmatpush3.msra.mxu1 %v734_v9  ;;  %3914 = vmatprep.subr.mxu0 %v645_v10  ;;  %v618_v57 = vld [vmem:[#allocation2 + $0x210] sm:$0xff]  ;;  %v633_v59 = vld [vmem:[#allocation2 + $0x288] sm:$0xff]  ;;  %v632_v0 = vld [vmem:[#allocation2 + $0x280] sm:$0xff] }
  0x5f   : > { %3949 = vmatprep.subr.mxu1 %v749_v11  ;;  %3915 = vmatpush3.msra.mxu0 %v629_v12  ;;  %v722_v58 = vld [vmem:[#allocation2 + $0x310] sm:$0xff]  ;;  %v737_v60 = vld [vmem:[#allocation2 + $0x388] sm:$0xff]  ;;  %v736_v1 = vld [vmem:[#allocation2 + $0x380] sm:$0xff] }
  0x60   : > { %3950 = vmatpush3.msra.mxu1 %v733_v13  ;;  %3916 = vmatprep.subr.mxu0 %v644_v14  ;;  %v617_v61 = vld [vmem:[#allocation2 + $0x208] sm:$0xff]  ;;  %v616_v2 = vld [vmem:[#allocation2 + $0x200] sm:$0xff] }
  0x61   : > { %3951 = vmatprep.subr.mxu1 %v748_v15  ;;  %3917 = vmatpush3.msra.mxu0 %v628_v16  ;;  %v721_v62 = vld [vmem:[#allocation2 + $0x308] sm:$0xff]  ;;  %v720_v3 = vld [vmem:[#allocation2 + $0x300] sm:$0xff] }
  0x62   : > { %3952 = vmatpush3.msra.mxu1 %v732_v17  ;;  %3918 = vmatprep.subr.mxu0 %v643_v18 }
  0x63   : > { %3953 = vmatprep.subr.mxu1 %v747_v19  ;;  %3919 = vmatpush3.msra.mxu0 %v627_v20 }
  0x64   : > { %3954 = vmatpush3.msra.mxu1 %v731_v21  ;;  %3920 = vmatprep.subr.mxu0 %v642_v22  ;;  %v824_v22 = vld [vmem:[%s5675_s4] sm:$0xf] }
  0x65   : > { %3955 = vmatprep.subr.mxu1 %v746_v23  ;;  %3921 = vmatpush3.msra.mxu0 %v626_v24  ;;  %v3774_v23 = vld [vmem:[%s5675_s4 + $0x4] sm:$0xf]  ;;  %v4983_v24 = vld [vmem:[#allocation6 + $0x78] sm:$0xff] }
  0x66   : > { %3956 = vmatpush3.msra.mxu1 %v730_v25  ;;  %3922 = vmatprep.subr.mxu0 %v641_v26  ;;  %v4985_v25 = vld [vmem:[#allocation6 + $0x38] sm:$0xff]  ;;  %v4989_v26 = vld [vmem:[#allocation6 + $0x70] sm:$0xff] }
  0x67   : > { %3957 = vmatprep.subr.mxu1 %v745_v27  ;;  %3923 = vmatpush3.msra.mxu0 %v625_v28  ;;  %v4991_v27 = vld [vmem:[#allocation6 + $0x30] sm:$0xff]  ;;  %v4997_v28 = vld [vmem:[#allocation6 + $0x68] sm:$0xff] }
  0x68   : > { %3958 = vmatpush3.msra.mxu1 %v729_v29  ;;  %3924 = vmatprep.subr.mxu0 %v640_v30  ;;  %v4999_v29 = vld [vmem:[#allocation6 + $0x28] sm:$0xff]  ;;  %v5005_v30 = vld [vmem:[#allocation6 + $0x60] sm:$0xff] }
  0x69   : > { %3959 = vmatprep.subr.mxu1 %v744_v31  ;;  %3925 = vmatpush3.msra.mxu0 %v624_v32  ;;  %v5007_v31 = vld [vmem:[#allocation6 + $0x20] sm:$0xff]  ;;  %v5013_v32 = vld [vmem:[#allocation6 + $0x58] sm:$0xff] }
  0x6a   : > { %3960 = vmatpush3.msra.mxu1 %v728_v33  ;;  %3926 = vmatprep.subr.mxu0 %v639_v34  ;;  %v5015_v33 = vld [vmem:[#allocation6 + $0x18] sm:$0xff]  ;;  %v5021_v34 = vld [vmem:[#allocation6 + $0x50] sm:$0xff] }
  0x6b   : > { %3961 = vmatprep.subr.mxu1 %v743_v35  ;;  %3927 = vmatpush3.msra.mxu0 %v623_v36  ;;  %v5023_v35 = vld [vmem:[#allocation6 + $0x10] sm:$0xff]  ;;  %v5029_v36 = vld [vmem:[#allocation6 + $0x48] sm:$0xff] }
  0x6c   : > { %3962 = vmatpush3.msra.mxu1 %v727_v37  ;;  %3928 = vmatprep.subr.mxu0 %v638_v38  ;;  %v5031_v37 = vld [vmem:[#allocation6 + $0x8] sm:$0xff]  ;;  %v5037_v38 = vld [vmem:[#allocation6 + $0x40] sm:$0xff] }
  0x6d   : > { %3963 = vmatprep.subr.mxu1 %v742_v39  ;;  %3929 = vmatpush3.msra.mxu0 %v622_v40  ;;  %v5039_v39 = vld [vmem:[#allocation6] sm:$0xff] }
  0x6e   : > { %3964 = vmatpush3.msra.mxu1 %v726_v41  ;;  %3930 = vmatprep.subr.mxu0 %v637_v42 }
  0x6f   : > { %3965 = vmatprep.subr.mxu1 %v741_v43  ;;  %3931 = vmatpush3.msra.mxu0 %v621_v44  ;;  %v3778_v43 = vld [vmem:[%s5675_s4 + $0x8] sm:$0xf]  ;;  %v3781_v44 = vld [vmem:[%s5675_s4 + $0xc] sm:$0xf] }
  0x70   : > { %3966 = vmatpush3.msra.mxu1 %v725_v45  ;;  %3932 = vmatprep.subr.mxu0 %v636_v46  ;;  %v5067_v46 = vld [vmem:[#allocation6 + $0xb8] sm:$0xff] }
  0x71   : > { %3967 = vmatprep.subr.mxu1 %v740_v47  ;;  %3933 = vmatpush3.msra.mxu0 %v620_v48  ;;  %v5069_v47 = vld [vmem:[#allocation6 + $0xf8] sm:$0xff] }
  0x72   : > { %3968 = vmatpush3.msra.mxu1 %v724_v49  ;;  %3934 = vmatprep.subr.mxu0 %v635_v50  ;;  %v5075_v50 = vld [vmem:[#allocation6 + $0xb0] sm:$0xff] }
  0x73   : > { %3969 = vmatprep.subr.mxu1 %v739_v51  ;;  %3935 = vmatpush3.msra.mxu0 %v619_v52  ;;  %v5077_v51 = vld [vmem:[#allocation6 + $0xf0] sm:$0xff] }
  0x74   : > { %3970 = vmatpush3.msra.mxu1 %v723_v53  ;;  %3936 = vmatprep.subr.mxu0 %v634_v54  ;;  %v5083_v54 = vld [vmem:[#allocation6 + $0xa8] sm:$0xff] }
  0x75   : > { %3971 = vmatprep.subr.mxu1 %v738_v55  ;;  %3937 = vmatpush3.msra.mxu0 %v618_v57  ;;  %v5085_v55 = vld [vmem:[#allocation6 + $0xe8] sm:$0xff]  ;;  %v5091_v57 = vld [vmem:[#allocation6 + $0xa0] sm:$0xff] }
  0x76   : > { %3972 = vmatpush3.msra.mxu1 %v722_v58  ;;  %3938 = vmatprep.subr.mxu0 %v633_v59  ;;  %v5093_v58 = vld [vmem:[#allocation6 + $0xe0] sm:$0xff]  ;;  %v5099_v59 = vld [vmem:[#allocation6 + $0x98] sm:$0xff] }
  0x77   : > { %3973 = vmatprep.subr.mxu1 %v737_v60  ;;  %3939 = vmatpush3.msra.mxu0 %v617_v61  ;;  %v5101_v60 = vld [vmem:[#allocation6 + $0xd8] sm:$0xff]  ;;  %v5107_v61 = vld [vmem:[#allocation6 + $0x90] sm:$0xff] }
  0x78   : > { %3974 = vmatpush3.msra.mxu1 %v721_v62  ;;  %3940 = vmatprep.subr.mxu0 %v632_v0  ;;  %v5109_v62 = vld [vmem:[#allocation6 + $0xd0] sm:$0xff]  ;;  %v5123_v0 = vld [vmem:[#allocation6 + $0x88] sm:$0xff] }
  0x79   : > { %3975 = vmatprep.subr.mxu1 %v736_v1  ;;  %3941 = vmatpush3.msra.mxu0 %v616_v2  ;;  %v5125_v1 = vld [vmem:[#allocation6 + $0xc8] sm:$0xff]  ;;  %v5129_v2 = vld [vmem:[#allocation6 + $0x80] sm:$0xff] }
  0x7a   : > { %712 = vmatprep.mubr.f32.mxu0 %v4955_v63  ;;  %3976 = vmatpush3.msra.mxu1 %v720_v3  ;;  %v5131_v3 = vld [vmem:[#allocation6 + $0xc0] sm:$0xff] }
  0x7b   : > { %816 = vmatprep.mubr.f32.mxu1 %v4955_v63  ;;  %713 = vmatmul.mubr.f32.vlgmr.msra.gmra.mxu0 %v4951_v56  ;;  %v5295_v63 = vld [vmem:[#allocation6 + $0x188] sm:$0xff] }
  0x7c   : > { %817 = vmatmul.mubr.f32.vlgmr.msra.gmra.mxu1 %v4951_v56  ;;  %4186 = vmatprep.subr.bf16.mxu0 %v4814_v4  ;;  %5717 = vst [vmem:[#allocation19_spill] sm:$0xff] %v5295_v63  ;;  %v5299_v56 = vld [vmem:[#allocation6 + $0x1d0] sm:$0xff] }
  0x7d   : > { %4192 = vmatprep.subr.bf16.mxu1 %v4814_v4  ;;  %4188 = vmatprep.mubr.msk.bf16.mxu0 %vm4815_vm0, %v4814_v4  ;;  %5718 = vst [vmem:[#allocation20_spill] sm:$0xff] %v5299_v56 }
  0x7e   : > { %4194 = vmatprep.mubr.msk.bf16.mxu1 %vm4815_vm0, %v4814_v4 }
 0x119   : > { %v3872_v5 = vpop.f32.mrf.mxu0 }
 0x11a   : > { %v3907_v6 = vpop.f32.mrf.mxu1 }
 0x11b   : > { %v3873_v7 = vpop.f32.mrf.mxu0 }
 0x11c   : > { %v3908_v8 = vpop.f32.mrf.mxu1  ;;  %v3874_v9 = vadd.f32 %v3873_v7, %v3872_v5 }
 0x11d   : > { %v3909_v10 = vadd.f32 %v3908_v8, %v3907_v6 }
 0x11f   : > { %v614_v15 = vmax.f32 %v3874_v9, %v3909_v10 }
 0x13b   : > { %v3942_v11 = vpop.f32.mrf.mxu0 }
 0x13c   : > { %v3977_v12 = vpop.f32.mrf.mxu1 }
 0x13d   : > { %v3943_v13 = vpop.f32.mrf.mxu0 }
 0x13e   : > { %v3978_v14 = vpop.f32.mrf.mxu1  ;;  %v3944_v16 = vadd.f32 %v3943_v13, %v3942_v11  ;;  %v3784_v13 = vld [vmem:[%s5675_s4 + $0x10] sm:$0xf] }
 0x13f   : > { %v3979_v18 = vadd.f32 %v3978_v14, %v3977_v12  ;;  %v3787_v14 = vld [vmem:[%s5675_s4 + $0x14] sm:$0xf] }
 0x140   : > { %v718_v17 = vmax.f32 %v614_v15, %v3944_v16  ;;  %v5155_v16 = vld [vmem:[#allocation6 + $0x138] sm:$0xff] }
 0x142   : > { %v822_v19 = vmax.f32 %v718_v17, %v3979_v18  ;;  %v5157_v17 = vld [vmem:[#allocation6 + $0x178] sm:$0xff] }
 0x144   : > { %v823_v20 = vpack.c.bf16 %v822_v19, %v822_v19 }
 0x146   : > { %v4971_v21 = vsel %vm829_vm1, %v823_v20, 0  ;;  %v5163_v20 = vld [vmem:[#allocation6 + $0x130] sm:$0xff] }
 0x147   : > { %4187 = vmatpush3.bf16.msra.mxu0 %v4971_v21  ;;  %4193 = vmatpush3.bf16.msra.mxu1 %v4971_v21 }
 0x148   : > { %4198 = vmatprep.subr.mxu0 %v4814_v4  ;;  %4217 = vmatprep.subr.mxu1 %v4814_v4 }
 0x14a   : > { %4189 = vmatmul.mubr.msk.bf16.vlgmr.msra.gmra.mxu0 %vm825_vm2, %v824_v22  ;;  %4195 = vmatmul.mubr.msk.bf16.vlgmr.msra.gmra.mxu1 %vm825_vm2, %v3774_v23  ;;  %v5165_v22 = vld [vmem:[#allocation6 + $0x170] sm:$0xff] }
 0x14b   : > { %4199 = vmatpush3.msra.mxu0 %v4983_v24  ;;  %4218 = vmatpush3.msra.mxu1 %v4985_v25 }
 0x14c   : > { %4200 = vmatprep.subr.mxu0 %v4814_v4  ;;  %4219 = vmatprep.subr.mxu1 %v4814_v4 }
 0x14d   : > { %4201 = vmatpush3.msra.mxu0 %v4989_v26  ;;  %4220 = vmatpush3.msra.mxu1 %v4991_v27 }
 0x14e   : > { %4202 = vmatprep.subr.mxu0 %v4814_v4  ;;  %4221 = vmatprep.subr.mxu1 %v4814_v4 }
 0x14f   : > { %4203 = vmatpush3.msra.mxu0 %v4997_v28  ;;  %4222 = vmatpush3.msra.mxu1 %v4999_v29 }
 0x150   : > { %4204 = vmatprep.subr.mxu0 %v4814_v4  ;;  %4223 = vmatprep.subr.mxu1 %v4814_v4 }
 0x151   : > { %4205 = vmatpush3.msra.mxu0 %v5005_v30  ;;  %4224 = vmatpush3.msra.mxu1 %v5007_v31 }
 0x152   : > { %4206 = vmatprep.subr.mxu0 %v4814_v4  ;;  %4225 = vmatprep.subr.mxu1 %v4814_v4 }
 0x153   : > { %4207 = vmatpush3.msra.mxu0 %v5013_v32  ;;  %4226 = vmatpush3.msra.mxu1 %v5015_v33 }
 0x154   : > { %4208 = vmatprep.subr.mxu0 %v4814_v4  ;;  %4227 = vmatprep.subr.mxu1 %v4814_v4 }
 0x155   : > { %4209 = vmatpush3.msra.mxu0 %v5021_v34  ;;  %4228 = vmatpush3.msra.mxu1 %v5023_v35 }
 0x156   : > { %4210 = vmatprep.subr.mxu0 %v4814_v4  ;;  %4229 = vmatprep.subr.mxu1 %v4814_v4 }
 0x157   : > { %4211 = vmatpush3.msra.mxu0 %v5029_v36  ;;  %4230 = vmatpush3.msra.mxu1 %v5031_v37 }
 0x158   : > { %4212 = vmatprep.subr.mxu0 %v4814_v4  ;;  %4231 = vmatprep.subr.mxu1 %v4814_v4 }
 0x159   : > { %4213 = vmatpush3.msra.mxu0 %v5037_v38  ;;  %4232 = vmatpush3.msra.mxu1 %v5039_v39 }
 0x15a   : > { %4214 = vmatprep.mubr.msk.f32.mxu0 %vm4815_vm0, %v4814_v4  ;;  %4233 = vmatprep.mubr.msk.f32.mxu1 %vm4815_vm0, %v4814_v4 }
 0x15b   : > { %4236 = vmatprep.subr.bf16.mxu1 %v4814_v4  ;;  %4261 = vmatprep.subr.bf16.mxu0 %v4814_v4 }
 0x20a   : > { %v867_v40 = vpop.f32.mrf.mxu0  ;;  %v920_v41 = vpop.f32.mrf.mxu1 }
 0x20b   : > { %4215 = vmatmul.mubr.msk.f32.vlgmr.msra.gmra.mxu0 %vm935_vm3, %v920_v41  ;;  %4234 = vmatmul.mubr.msk.f32.vlgmr.msra.gmra.mxu1 %vm935_vm3, %v867_v40  ;;  %v5171_v41 = vld [vmem:[#allocation6 + $0x128] sm:$0xff] }
 0x20c   : > { %4237 = vmatpush3.bf16.msra.mxu1 %v4971_v21  ;;  %4262 = vmatpush3.bf16.msra.mxu0 %v4971_v21  ;;  %v4190_v42 = vpop.f32.mrf.mxu0  ;;  %v4196_v45 = vpop.f32.mrf.mxu1 }
 0x20d   : > { %4238 = vmatprep.mubr.msk.bf16.mxu1 %vm4815_vm0, %v4814_v4  ;;  %4263 = vmatprep.mubr.msk.bf16.mxu0 %vm4815_vm0, %v4814_v4  ;;  %v5173_v42 = vld [vmem:[#allocation6 + $0x168] sm:$0xff]  ;;  %v5187_v45 = vld [vmem:[#allocation6 + $0x118] sm:$0xff] }
 0x20e   : > { %v870_v48 = vpop.f32.mrf.mxu0  ;;  %v923_v49 = vpop.f32.mrf.mxu1  ;;  %4242 = vmatprep.subr.mxu1 %v4814_v4  ;;  %4267 = vmatprep.subr.mxu0 %v4814_v4 }
 0x20f   : > { %4239 = vmatmul.mubr.msk.bf16.vlgmr.msra.gmra.mxu1 %vm825_vm2, %v3778_v43  ;;  %4264 = vmatmul.mubr.msk.bf16.vlgmr.msra.gmra.mxu0 %vm825_vm2, %v3781_v44  ;;  %v5179_v43 = vld [vmem:[#allocation6 + $0x120] sm:$0xff]  ;;  %v5189_v48 = vld [vmem:[#allocation6 + $0x158] sm:$0xff]  ;;  %v5195_v49 = vld [vmem:[#allocation6 + $0x110] sm:$0xff] }
 0x210   : > { %v4191_v52 = vpop.f32.mrf.mxu0  ;;  %v4197_v53 = vpop.f32.mrf.mxu1  ;;  %4243 = vmatpush3.msra.mxu1 %v5067_v46  ;;  %4268 = vmatpush3.msra.mxu0 %v5069_v47  ;;  %v5181_v44 = vld [vmem:[#allocation6 + $0x160] sm:$0xff] }
 0x211   : > { %4244 = vmatprep.subr.mxu1 %v4814_v4  ;;  %4269 = vmatprep.subr.mxu0 %v4814_v4  ;;  %v5197_v52 = vld [vmem:[#allocation6 + $0x150] sm:$0xff]  ;;  %v5211_v53 = vld [vmem:[#allocation6 + $0x108] sm:$0xff] }
 0x212   : > { %4245 = vmatpush3.msra.mxu1 %v5075_v50  ;;  %4270 = vmatpush3.msra.mxu0 %v5077_v51 }
 0x213   : > { %4246 = vmatprep.subr.mxu1 %v4814_v4  ;;  %4271 = vmatprep.subr.mxu0 %v4814_v4 }
 0x214   : > { %4247 = vmatpush3.msra.mxu1 %v5083_v54  ;;  %4272 = vmatpush3.msra.mxu0 %v5085_v55 }
 0x215   : > { %4248 = vmatprep.subr.mxu1 %v4814_v4  ;;  %4273 = vmatprep.subr.mxu0 %v4814_v4 }
 0x216   : > { %4249 = vmatpush3.msra.mxu1 %v5091_v57  ;;  %4274 = vmatpush3.msra.mxu0 %v5093_v58 }
 0x217   : > { %4250 = vmatprep.subr.mxu1 %v4814_v4  ;;  %4275 = vmatprep.subr.mxu0 %v4814_v4 }
 0x218   : > { %4251 = vmatpush3.msra.mxu1 %v5099_v59  ;;  %4276 = vmatpush3.msra.mxu0 %v5101_v60 }
 0x219   : > { %4252 = vmatprep.subr.mxu1 %v4814_v4  ;;  %4277 = vmatprep.subr.mxu0 %v4814_v4 }
 0x21a   : > { %4253 = vmatpush3.msra.mxu1 %v5107_v61  ;;  %4278 = vmatpush3.msra.mxu0 %v5109_v62 }
 0x21b   : > { %4254 = vmatprep.subr.mxu1 %v4814_v4  ;;  %4279 = vmatprep.subr.mxu0 %v4814_v4 }
 0x21c   : > { %4258 = vmatprep.mubr.msk.f32.mxu1 %vm4815_vm0, %v4814_v4  ;;  %4283 = vmatprep.mubr.msk.f32.mxu0 %vm4815_vm0, %v4814_v4 }
 0x21d   : > { %4255 = vmatpush3.msra.mxu1 %v5123_v0  ;;  %4280 = vmatpush3.msra.mxu0 %v5125_v1 }
 0x21e   : > { %4256 = vmatprep.subr.mxu1 %v4814_v4  ;;  %4281 = vmatprep.subr.mxu0 %v4814_v4 }
 0x21f   : > { %4257 = vmatpush3.msra.mxu1 %v5129_v2  ;;  %4282 = vmatpush3.msra.mxu0 %v5131_v3 }
 0x220   : > { %4286 = vmatprep.subr.bf16.mxu1 %v4814_v4  ;;  %4311 = vmatprep.subr.bf16.mxu0 %v4814_v4 }
 0x2cb   : > { %v1005_v5 = vpop.f32.mrf.mxu0  ;;  %v1078_v6 = vpop.f32.mrf.mxu1 }
 0x2cc   : > { %v5139_v7 = vadd.f32 %v1078_v6, %v1005_v5  ;;  %v5213_v5 = vld [vmem:[#allocation6 + $0x148] sm:$0xff]  ;;  %v5219_v6 = vld [vmem:[#allocation6 + $0x100] sm:$0xff] }
 0x2cd   : > { %v4216_v8 = vpop.f32.mrf.mxu0  ;;  %v4235_v9 = vpop.f32.mrf.mxu1 }
 0x2ce   : > { %v5221_v8 = vld [vmem:[#allocation6 + $0x140] sm:$0xff] }
 0x2cf   : > { %v1121_v10 = vpop.f32.mrf.mxu1  ;;  %v1249_v11 = vpop.f32.mrf.mxu0 }
 0x2d0   : > { %4259 = vmatmul.mubr.msk.f32.vlgmr.msra.gmra.mxu1 %vm935_vm3, %v1121_v10  ;;  %4284 = vmatmul.mubr.msk.f32.vlgmr.msra.gmra.mxu0 %vm935_vm3, %v1249_v11 }
 0x2d1   : > { %4287 = vmatpush3.bf16.msra.mxu1 %v4971_v21  ;;  %4312 = vmatpush3.bf16.msra.mxu0 %v4971_v21  ;;  %v4240_v12 = vpop.f32.mrf.mxu1  ;;  %v4265_v15 = vpop.f32.mrf.mxu0 }
 0x2d2   : > { %4288 = vmatprep.mubr.msk.bf16.mxu1 %vm4815_vm0, %v4814_v4  ;;  %4313 = vmatprep.mubr.msk.bf16.mxu0 %vm4815_vm0, %v4814_v4 }
 0x2d3   : > { %v1124_v18 = vpop.f32.mrf.mxu1  ;;  %4292 = vmatprep.subr.mxu1 %v4814_v4  ;;  %4317 = vmatprep.subr.mxu0 %v4814_v4  ;;  %v1252_v19 = vpop.f32.mrf.mxu0 }
 0x2d4   : > { %4289 = vmatmul.mubr.msk.bf16.vlgmr.msra.gmra.mxu1 %vm825_vm2, %v3784_v13  ;;  %4314 = vmatmul.mubr.msk.bf16.vlgmr.msra.gmra.mxu0 %vm825_vm2, %v3787_v14 }
 0x2d5   : > { %v4241_v23 = vpop.f32.mrf.mxu1  ;;  %4293 = vmatpush3.msra.mxu1 %v5155_v16  ;;  %4318 = vmatpush3.msra.mxu0 %v5157_v17  ;;  %v4266_v40 = vpop.f32.mrf.mxu0 }
 0x2d6   : > { %4294 = vmatprep.subr.mxu1 %v4814_v4  ;;  %4319 = vmatprep.subr.mxu0 %v4814_v4  ;;  %v3790_v23 = vld [vmem:[%s5675_s4 + $0x18] sm:$0xf] }
 0x2d7   : > { %4295 = vmatpush3.msra.mxu1 %v5163_v20  ;;  %4320 = vmatpush3.msra.mxu0 %v5165_v22 }
 0x2d8   : > { %4296 = vmatprep.subr.mxu1 %v4814_v4  ;;  %4321 = vmatprep.subr.mxu0 %v4814_v4 }
 0x2d9   : > { %4297 = vmatpush3.msra.mxu1 %v5171_v41  ;;  %4322 = vmatpush3.msra.mxu0 %v5173_v42 }
 0x2da   : > { %4298 = vmatprep.subr.mxu1 %v4814_v4  ;;  %4323 = vmatprep.subr.mxu0 %v4814_v4 }
 0x2db   : > { %4299 = vmatpush3.msra.mxu1 %v5179_v43  ;;  %4324 = vmatpush3.msra.mxu0 %v5181_v44 }
 0x2dc   : > { %4300 = vmatprep.subr.mxu1 %v4814_v4  ;;  %4325 = vmatprep.subr.mxu0 %v4814_v4 }
 0x2dd   : > { %4301 = vmatpush3.msra.mxu1 %v5187_v45  ;;  %4326 = vmatpush3.msra.mxu0 %v5189_v48 }
 0x2de   : > { %4302 = vmatprep.subr.mxu1 %v4814_v4  ;;  %4327 = vmatprep.subr.mxu0 %v4814_v4 }
 0x2df   : > { %4303 = vmatpush3.msra.mxu1 %v5195_v49  ;;  %4328 = vmatpush3.msra.mxu0 %v5197_v52 }
 0x2e0   : > { %4304 = vmatprep.subr.mxu1 %v4814_v4  ;;  %4329 = vmatprep.subr.mxu0 %v4814_v4 }
 0x2e1   : > { %4308 = vmatprep.mubr.msk.f32.mxu1 %vm4815_vm0, %v4814_v4  ;;  %4333 = vmatprep.mubr.msk.f32.mxu0 %vm4815_vm0, %v4814_v4 }
 0x2e2   : > { %4305 = vmatpush3.msra.mxu1 %v5211_v53  ;;  %4330 = vmatpush3.msra.mxu0 %v5213_v5 }
 0x2e3   : > { %4306 = vmatprep.subr.mxu1 %v4814_v4  ;;  %4331 = vmatprep.subr.mxu0 %v4814_v4 }
 0x2e4   : > { %4307 = vmatpush3.msra.mxu1 %v5219_v6  ;;  %4332 = vmatpush3.msra.mxu0 %v5221_v8 }
 0x2e5   : > { %4336 = vmatprep.subr.bf16.mxu1 %v4814_v4  ;;  %4361 = vmatprep.subr.bf16.mxu0 %v4814_v4 }
 0x390   : > { %v1205_v9 = vpop.f32.mrf.mxu1  ;;  %v1333_v10 = vpop.f32.mrf.mxu0 }
 0x391   : > { %v1209_v11 = vadd.f32 %v1205_v9, %v5139_v7  ;;  %v3793_v7 = vld [vmem:[%s5675_s4 + $0x1c] sm:$0xf] }
 0x392   : > { %v4260_v12 = vpop.f32.mrf.mxu1  ;;  %v4285_v13 = vpop.f32.mrf.mxu0  ;;  %v5244_v9 = vld [vmem:[#allocation6 + $0x1b8] sm:$0xff] }
 0x393   : > { %v5228_v14 = vadd.f32 %v1333_v10, %v1209_v11  ;;  %v5246_v10 = vld [vmem:[#allocation6 + $0x1f8] sm:$0xff]  ;;  %v5252_v13 = vld [vmem:[#allocation6 + $0x1b0] sm:$0xff] }
 0x394   : > { %v1377_v15 = vpop.f32.mrf.mxu1  ;;  %v1505_v18 = vpop.f32.mrf.mxu0  ;;  %5709 = vst [vmem:[#allocation11_spill] sm:$0xff] %v5246_v10 }
 0x395   : > { %4309 = vmatmul.mubr.msk.f32.vlgmr.msra.gmra.mxu1 %vm935_vm3, %v1377_v15  ;;  %4334 = vmatmul.mubr.msk.f32.vlgmr.msra.gmra.mxu0 %vm935_vm3, %v1505_v18  ;;  %v5254_v15 = vld [vmem:[#allocation6 + $0x1f0] sm:$0xff] }
 0x396   : > { %4337 = vmatpush3.bf16.msra.mxu1 %v4971_v21  ;;  %4362 = vmatpush3.bf16.msra.mxu0 %v4971_v21  ;;  %v4290_v19 = vpop.f32.mrf.mxu1  ;;  %v4315_v40 = vpop.f32.mrf.mxu0  ;;  %5710 = vst [vmem:[#allocation12_spill] sm:$0xff] %v5254_v15 }
 0x397   : > { %4338 = vmatprep.mubr.msk.bf16.mxu1 %vm4815_vm0, %v4814_v4  ;;  %4363 = vmatprep.mubr.msk.bf16.mxu0 %vm4815_vm0, %v4814_v4  ;;  %v5259_v40 = vld [vmem:[#allocation6 + $0x1a8] sm:$0xff] }
 0x398   : > { %v1380_v11 = vpop.f32.mrf.mxu1  ;;  %4342 = vmatprep.subr.mxu1 %v4814_v4  ;;  %4367 = vmatprep.subr.mxu0 %v4814_v4  ;;  %v1508_v12 = vpop.f32.mrf.mxu0 }
 0x399   : > { %4339 = vmatmul.mubr.msk.bf16.vlgmr.msra.gmra.mxu1 %vm825_vm2, %v3790_v23  ;;  %4364 = vmatmul.mubr.msk.bf16.vlgmr.msra.gmra.mxu0 %vm825_vm2, %v3793_v7  ;;  %v5262_v11 = vld [vmem:[#allocation6 + $0x1e8] sm:$0xff]  ;;  %v5267_v23 = vld [vmem:[#allocation6 + $0x1a0] sm:$0xff]  ;;  %v5275_v12 = vld [vmem:[#allocation6 + $0x198] sm:$0xff] }
 0x39a   : > { %v4291_v18 = vpop.f32.mrf.mxu1  ;;  %4343 = vmatpush3.msra.mxu1 %v5244_v9  ;;  %4368 = vmatpush3.msra.mxu0 %v5246_v10  ;;  %v4316_v19 = vpop.f32.mrf.mxu0  ;;  %5711 = vst [vmem:[#allocation13_spill] sm:$0xff] %v5262_v11  ;;  %5712 = vst [vmem:[#allocation14_spill] sm:$0xff] %v5267_v23  ;;  %v5270_v7 = vld [vmem:[#allocation6 + $0x1e0] sm:$0xff] }
 0x39b   : > { %4344 = vmatprep.subr.mxu1 %v4814_v4  ;;  %4369 = vmatprep.subr.mxu0 %v4814_v4  ;;  %5713 = vst [vmem:[#allocation15_spill] sm:$0xff] %v5270_v7  ;;  %5714 = vst [vmem:[#allocation16_spill] sm:$0xff] %v5275_v12  ;;  %v5281_v18 = vld [vmem:[#allocation6 + $0x190] sm:$0xff]  ;;  %v5292_v19 = vld [vmem:[#allocation6 + $0x1d8] sm:$0xff] }
 0x39c   : > { %4345 = vmatpush3.msra.mxu1 %v5252_v13  ;;  %4370 = vmatpush3.msra.mxu0 %v5254_v15  ;;  %5715 = vst [vmem:[#allocation17_spill] sm:$0xff] %v5281_v18  ;;  %5716 = vst [vmem:[#allocation18_spill] sm:$0xff] %v5292_v19 }
 0x39d   : > { %4346 = vmatprep.subr.mxu1 %v4814_v4  ;;  %4371 = vmatprep.subr.mxu0 %v4814_v4 }
 0x39e   : > { %4347 = vmatpush3.msra.mxu1 %v5259_v40  ;;  %4372 = vmatpush3.msra.mxu0 %v5262_v11  ;;  %v5307_v11 = vld [vmem:[#allocation6 + $0x1c8] sm:$0xff] }
 0x39f   : > { %4348 = vmatprep.subr.mxu1 %v4814_v4  ;;  %4373 = vmatprep.subr.mxu0 %v4814_v4  ;;  %5720 = vst [vmem:[#allocation22_spill] sm:$0xff] %v5307_v11 }
 0x3a0   : > { %4349 = vmatpush3.msra.mxu1 %v5267_v23  ;;  %4374 = vmatpush3.msra.mxu0 %v5270_v7  ;;  %v5303_v7 = vld [vmem:[#allocation6 + $0x180] sm:$0xff] }
 0x3a1   : > { %4350 = vmatprep.subr.mxu1 %v4814_v4  ;;  %4375 = vmatprep.subr.mxu0 %v4814_v4  ;;  %5719 = vst [vmem:[#allocation21_spill] sm:$0xff] %v5303_v7 }
 0x3a2   : > { %4351 = vmatpush3.msra.mxu1 %v5275_v12  ;;  %4358 = vmatprep.mubr.msk.f32.mxu1 %vm4815_vm0, %v4814_v4 }
 0x3a3   : > { %4352 = vmatprep.subr.mxu1 %v4814_v4  ;;  %4383 = vmatprep.mubr.msk.f32.mxu0 %vm4815_vm0, %v4814_v4 }
 0x3a4   : > { %4353 = vmatpush3.msra.mxu1 %v5281_v18  ;;  %4376 = vmatpush3.msra.mxu0 %v5292_v19  ;;  %v5312_v19 = vld [vmem:[#allocation6 + $0x1c0] sm:$0xff] }
 0x3a5   : > { %4354 = vmatprep.subr.mxu1 %v4814_v4  ;;  %4377 = vmatprep.subr.mxu0 %v4814_v4  ;;  %5721 = vst [vmem:[#allocation23_spill] sm:$0xff] %v5312_v19 }
 0x3a6   : > { %4355 = vmatpush3.msra.mxu1 %v5295_v63  ;;  %4378 = vmatpush3.msra.mxu0 %v5299_v56 }
 0x3a7   : > { %4356 = vmatprep.subr.mxu1 %v4814_v4  ;;  %4379 = vmatprep.subr.mxu0 %v4814_v4 }
 0x3a8   : > { %4357 = vmatpush3.msra.mxu1 %v5303_v7  ;;  %4380 = vmatpush3.msra.mxu0 %v5307_v11 }
 0x3a9   : > { %4386 = vmatprep.subr.bf16.mxu1 %v4814_v4  ;;  %4381 = vmatprep.subr.mxu0 %v4814_v4 }
 0x3aa   : > { %4382 = vmatpush3.msra.mxu0 %v5312_v19  ;;  %v3796_v19 = vld [vmem:[%s5675_s4 + $0x20] sm:$0xf] }
 0x3ab   : > { %4411 = vmatprep.subr.bf16.mxu0 %v4814_v4 }
 0x455   : > { %v1461_v56 = vpop.f32.mrf.mxu1  ;;  %v1589_v63 = vpop.f32.mrf.mxu0 }
 0x456   : > { %v1465_v7 = vadd.f32 %v1461_v56, %v5228_v14 }
 0x457   : > { %v4310_v18 = vpop.f32.mrf.mxu1  ;;  %v4335_v15 = vpop.f32.mrf.mxu0 }
 0x458   : > { %v1593_v12 = vadd.f32 %v1589_v63, %v1465_v7  ;;  %v5326_v63 = vld [vmem:[#allocation6 + $0x238] sm:$0xff]  ;;  %v5341_v7 = vld [vmem:[#allocation6 + $0x220] sm:$0xff] }
 0x459   : > { %v1633_v10 = vpop.f32.mrf.mxu1  ;;  %v1761_v23 = vpop.f32.mrf.mxu0  ;;  %5722 = vst [vmem:[#allocation24_spill] sm:$0xff] %v5326_v63  ;;  %5725 = vst [vmem:[#allocation27_spill] sm:$0xff] %v5341_v7  ;;  %v5345_v18 = vld [vmem:[#allocation6 + $0x218] sm:$0xff] }
 0x45a   : > { %4359 = vmatmul.mubr.msk.f32.vlgmr.msra.gmra.mxu1 %vm935_vm3, %v1633_v10  ;;  %4384 = vmatmul.mubr.msk.f32.vlgmr.msra.gmra.mxu0 %vm935_vm3, %v1761_v23  ;;  %v5337_v23 = vld [vmem:[#allocation6 + $0x228] sm:$0xff]  ;;  %5726 = vst [vmem:[#allocation28_spill] sm:$0xff] %v5345_v18 }
 0x45b   : > { %4387 = vmatpush3.bf16.msra.mxu1 %v4971_v21  ;;  %v4340_v11 = vpop.f32.mrf.mxu1  ;;  %4388 = vmatprep.mubr.msk.bf16.mxu1 %vm4815_vm0, %v4814_v4  ;;  %v4365_v56 = vpop.f32.mrf.mxu0  ;;  %v5331_v21 = vld [vmem:[#allocation6 + $0x230] sm:$0xff]  ;;  %5724 = vst [vmem:[#allocation26_spill] sm:$0xff] %v5337_v23 }
 0x45c   : > { %4392 = vmatprep.subr.mxu1 %v4814_v4  ;;  %4413 = vmatprep.mubr.msk.bf16.mxu0 %vm4815_vm0, %v4814_v4  ;;  %5723 = vst [vmem:[#allocation25_spill] sm:$0xff] %v5331_v21  ;;  %v5355_v56 = vld [vmem:[#allocation6 + $0x208] sm:$0xff] }
 0x45d   : > { %v1636_v14 = vpop.f32.mrf.mxu1  ;;  %v1764_v10 = vpop.f32.mrf.mxu0  ;;  %5728 = vst [vmem:[#allocation30_spill] sm:$0xff] %v5355_v56 }
 0x45e   : > { %4389 = vmatmul.mubr.msk.bf16.vlgmr.msra.gmra.mxu1 %vm825_vm2, %v3796_v19  ;;  %v5351_v19 = vld [vmem:[#allocation6 + $0x210] sm:$0xff]  ;;  %v5359_v14 = vld [vmem:[#allocation6 + $0x200] sm:$0xff] }
 0x45f   : > { %v4341_v15 = vpop.f32.mrf.mxu1  ;;  %4393 = vmatpush3.msra.mxu1 %v5326_v63  ;;  %v4366_v11 = vpop.f32.mrf.mxu0  ;;  %4408 = vmatprep.mubr.msk.f32.mxu1 %vm4815_vm0, %v4814_v4  ;;  %5727 = vst [vmem:[#allocation29_spill] sm:$0xff] %v5351_v19  ;;  %5729 = vst [vmem:[#allocation31_spill] sm:$0xff] %v5359_v14  ;;  %v1978_v10 = vld [vmem:[%s5676_s5] sm:$0xff] }
 0x460   : > { %4394 = vmatprep.subr.mxu1 %v4814_v4  ;;  %v4816_v15 = vmov 0  }
 0x461   : > { %4395 = vmatpush3.msra.mxu1 %v5331_v21  ;;  %4706 = vset.pattern.permute.xlu0 %v4816_v15 }
 0x462   : > { %4396 = vmatprep.subr.mxu1 %v4814_v4  ;;  %4707 = vset.pattern.permute.xlu1 %v4816_v15 }
 0x463   : > { %4397 = vmatpush3.msra.mxu1 %v5337_v23  ;;  %1981 = vperm.xlu0 %4706, %v1978_v10  }
 0x464   : > { %4398 = vmatprep.subr.mxu1 %v4814_v4 }
 0x465   : > { %4399 = vmatpush3.msra.mxu1 %v5341_v7 }
 0x466   : > { %4400 = vmatprep.subr.mxu1 %v4814_v4 }
 0x467   : > { %4401 = vmatpush3.msra.mxu1 %v5345_v18 }
 0x468   : > { %4402 = vmatprep.subr.mxu1 %v4814_v4 }
 0x469   : > { %4403 = vmatpush3.msra.mxu1 %v5351_v19 }
 0x46a   : > { %4404 = vmatprep.subr.mxu1 %v4814_v4 }
 0x46b   : > { %4405 = vmatpush3.msra.mxu1 %v5355_v56 }
 0x46c   : > { %4406 = vmatprep.subr.mxu1 %v4814_v4 }
 0x46d   : > { %4407 = vmatpush3.msra.mxu1 %v5359_v14 }
 0x46e   : > { %4423 = vmatprep.subr.mxu1 %v4814_v4 }
 0x51a   : > { %v1717_v11 = vpop.f32.mrf.mxu1  ;;  %v1845_v19 = vpop.f32.mrf.mxu0 }
 0x51b   : > { %v1721_v18 = vadd.f32 %v1717_v11, %v1593_v12 }
 0x51c   : > { %v4360_v56 = vpop.f32.mrf.mxu1  ;;  %v4385_v7 = vpop.f32.mrf.mxu0 }
 0x51d   : > { %v1849_v23 = vadd.f32 %v1845_v19, %v1721_v18 }
 0x51e   : > { %v1889_v21 = vpop.f32.mrf.mxu1 }
 0x51f   : > { %4409 = vmatmul.mubr.msk.f32.vlgmr.msra.gmra.mxu1 %vm935_vm3, %v1889_v21 }
 0x520   : > { %v4390_v14 = vpop.f32.mrf.mxu1  ;;  %4424 = vmatpush3.msra.mxu1 %v4983_v24  ;;  %4439 = vmatprep.mubr.msk.f32.mxu1 %vm4815_vm0, %v4814_v4 }
 0x521   : > { %4425 = vmatprep.subr.mxu1 %v4814_v4 }
 0x522   : > { %v1892_v63 = vpop.f32.mrf.mxu1  ;;  %4426 = vmatpush3.msra.mxu1 %v4989_v26  ;;  %v1982_v26 = vpop.permute.xlu0 %1981 }
 0x523   : > { %4427 = vmatprep.subr.mxu1 %v4814_v4 }
 0x524   : > { %v4391_v12 = vpop.f32.mrf.mxu1  ;;  %4428 = vmatpush3.msra.mxu1 %v4997_v28 }
 0x525   : > { %4429 = vmatprep.subr.mxu1 %v4814_v4 }
 0x526   : > { %4430 = vmatpush3.msra.mxu1 %v5005_v30 }
 0x527   : > { %4431 = vmatprep.subr.mxu1 %v4814_v4 }
 0x528   : > { %4432 = vmatpush3.msra.mxu1 %v5013_v32 }
 0x529   : > { %4433 = vmatprep.subr.mxu1 %v4814_v4 }
 0x52a   : > { %4434 = vmatpush3.msra.mxu1 %v5021_v34 }
 0x52b   : > { %4435 = vmatprep.subr.mxu1 %v4814_v4 }
 0x52c   : > { %4436 = vmatpush3.msra.mxu1 %v5029_v36 }
 0x52d   : > { %4437 = vmatprep.subr.mxu1 %v4814_v4 }
 0x52e   : > { %4438 = vmatpush3.msra.mxu1 %v5037_v38 }
 0x52f   : > { %4461 = vmatprep.subr.bf16.mxu1 %v4814_v4 }
 0x5df   : > { %v1973_v24 = vpop.f32.mrf.mxu1 }
 0x5e0   : > { %v1977_v28 = vadd.f32 %v1973_v24, %v1849_v23 }
 0x5e1   : > { %v4410_v30 = vpop.f32.mrf.mxu1 }
 0x5e2   : > { %v1984_v63 = vadd.f32 %v1982_v26, %v1977_v28  ;;  %v2005_v30 = vld [vmem:[%s5677_s6] sm:$0xf] }
 0x5e4   : > { %v1985_v32 = vsel %vm935_vm3, %v1984_v63, 0.0  ;;  %v1988_v21 = vmul.f32 %v1984_v63, %v1984_v63 }
 0x5e5   : > { %1986 = vadd.xlane.f32.xlu0 %v1985_v32 }
 0x5e6   : > { %v1989_v34 = vsel %vm935_vm3, %v1988_v21, 0.0  ;;  %v5732_v21 = vld [vmem:[#allocation16_spill] sm:$0xff] }
 0x5e7   : > { %1990 = vadd.xlane.f32.xlu1 %v1989_v34  ;;  %v5734_v34 = vld [vmem:[#allocation17_spill] sm:$0xff] }
 0x66e   : > { %v1987_v7 = vpop.xlane.xlu0 %1986 }
 0x66f   : > { %v1992_v36 = vmul.f32 0.015625, %v1987_v7  ;;  %v5735_v7 = vld [vmem:[#allocation13_spill] sm:$0xff] }
 0x670   : > { %v1991_v18 = vpop.xlane.xlu1 %1990 }
 0x671   : > { %v1994_v19 = vmul.f32 %v1992_v36, %v1992_v36  ;;  %v1993_v56 = vmul.f32 0.015625, %v1991_v18  ;;  %v1997_v15 = vsub.f32 %v1984_v63, %v1992_v36  ;;  %v3800_v63 = vld [vmem:[%s5677_s6 + $0x4] sm:$0xf]  ;;  %v5736_v36 = vld [vmem:[#allocation19_spill] sm:$0xff] }
 0x672   : > { %v5737_v18 = vld [vmem:[#allocation15_spill] sm:$0xff] }
 0x673   : > { %v1995_v38 = vsub.f32 %v1993_v56, %v1994_v19  ;;  %v5738_v19 = vld [vmem:[#allocation21_spill] sm:$0xff]  ;;  %v5739_v56 = vld [vmem:[#allocation18_spill] sm:$0xff] }
 0x675   : > { %v1996_v14 = vmax.f32 %v1995_v38, 0.0  ;;  %v5740_v38 = vld [vmem:[#allocation20_spill] sm:$0xff] }
 0x677   : > { %v1998_v10 = vadd.f32 1e-05, %v1996_v14  ;;  %v5741_v14 = vld [vmem:[#allocation22_spill] sm:$0xff] }
 0x679   : > { %4709 = vrsqrt.f32 %v1998_v10  ;;  %v5742_v10 = vld [vmem:[#allocation23_spill] sm:$0xff] }
 0x686   : > { %v4710_v23 = vpop.eup %4709 }
 0x687   : > { %v2000_v11 = vmul.f32 %v4710_v23, %v1997_v15 }
 0x689   : > { %vm2001_vm4 = vcmp.ge.f32.partialorder %v2000_v11, 0.0  ;;  %v2002_v12 = vmul.f32 0.01, %v2000_v11 }
 0x68b   : > { %v2003_v24 = vsel %vm2001_vm4, %v2000_v11, %v2002_v12 }
 0x68c   : > { %v2004_v26 = vpack.c.bf16 %v2003_v24, %v2003_v24 }
 0x68e   : > { %v5388_v28 = vsel %vm2010_vm5, %v2004_v26, 0  ;;  %v3822_v26 = vld [vmem:[%s5677_s6 + $0x20] sm:$0xf] }
 0x68f   : > { %4412 = vmatpush3.bf16.msra.mxu0 %v5388_v28 }
 0x690   : > { %4417 = vmatprep.subr.bf16.mxu0 %v4814_v4 }
 0x692   : > { %4414 = vmatmul.mubr.msk.bf16.vlgmr.msra.gmra.mxu0 %vm2006_vm6, %v2005_v30 }
 0x693   : > { %4418 = vmatpush3.bf16.msra.mxu0 %v5388_v28  ;;  %4419 = vmatprep.mubr.msk.bf16.mxu0 %vm4815_vm0, %v4814_v4 }
 0x694   : > { %4442 = vmatprep.subr.mxu0 %v4814_v4 }
 0x69a   : > { %4420 = vmatmul.mubr.msk.bf16.vlgmr.msra.gmra.mxu0 %vm2006_vm6, %v3800_v63 }
 0x69b   : > { %4443 = vmatpush3.msra.mxu0 %v4985_v25  ;;  %4458 = vmatprep.mubr.msk.f32.mxu0 %vm4815_vm0, %v4814_v4 }
 0x69c   : > { %4444 = vmatprep.subr.mxu0 %v4814_v4 }
 0x69d   : > { %4445 = vmatpush3.msra.mxu0 %v4991_v27 }
 0x69e   : > { %4446 = vmatprep.subr.mxu0 %v4814_v4 }
 0x69f   : > { %4447 = vmatpush3.msra.mxu0 %v4999_v29 }
 0x6a0   : > { %4448 = vmatprep.subr.mxu0 %v4814_v4 }
 0x6a1   : > { %4449 = vmatpush3.msra.mxu0 %v5007_v31 }
 0x6a2   : > { %4450 = vmatprep.subr.mxu0 %v4814_v4 }
 0x6a3   : > { %4451 = vmatpush3.msra.mxu0 %v5015_v33 }
 0x6a4   : > { %4452 = vmatprep.subr.mxu0 %v4814_v4 }
 0x6a5   : > { %4453 = vmatpush3.msra.mxu0 %v5023_v35 }
 0x6a6   : > { %4454 = vmatprep.subr.mxu0 %v4814_v4 }
 0x6a7   : > { %4455 = vmatpush3.msra.mxu0 %v5031_v37  ;;  %v3804_v37 = vld [vmem:[%s5677_s6 + $0x8] sm:$0xf] }
 0x6a8   : > { %4456 = vmatprep.subr.mxu0 %v4814_v4 }
 0x6a9   : > { %4457 = vmatpush3.msra.mxu0 %v5039_v39 }
 0x6aa   : > { %4467 = vmatprep.subr.mxu0 %v4814_v4 }
 0x752   : > { %v2048_v25 = vpop.f32.mrf.mxu0 }
 0x753   : > { %4459 = vmatmul.mubr.msk.f32.vlgmr.msra.gmra.mxu0 %vm935_vm3, %v2048_v25 }
 0x754   : > { %v4415_v27 = vpop.f32.mrf.mxu0  ;;  %4468 = vmatpush3.msra.mxu0 %v5067_v46  ;;  %4483 = vmatprep.mubr.msk.f32.mxu0 %vm4815_vm0, %v4814_v4 }
 0x755   : > { %4469 = vmatprep.subr.mxu0 %v4814_v4 }
 0x756   : > { %v2051_v29 = vpop.f32.mrf.mxu0  ;;  %4470 = vmatpush3.msra.mxu0 %v5075_v50  ;;  %v3807_v50 = vld [vmem:[%s5677_s6 + $0xc] sm:$0xf] }
 0x757   : > { %4471 = vmatprep.subr.mxu0 %v4814_v4 }
 0x758   : > { %v4416_v31 = vpop.f32.mrf.mxu0  ;;  %4472 = vmatpush3.msra.mxu0 %v5083_v54 }
 0x759   : > { %4473 = vmatprep.subr.mxu0 %v4814_v4  ;;  %v5743_v31 = vld [vmem:[#allocation24_spill] sm:$0xff] }
 0x75a   : > { %v2093_v33 = vpop.f32.mrf.mxu0  ;;  %4474 = vmatpush3.msra.mxu0 %v5091_v57 }
 0x75b   : > { %4440 = vmatmul.mubr.msk.f32.vlgmr.msra.gmra.mxu1 %vm935_vm3, %v2093_v33  ;;  %4475 = vmatprep.subr.mxu0 %v4814_v4  ;;  %v5744_v33 = vld [vmem:[#allocation25_spill] sm:$0xff] }
 0x75c   : > { %4462 = vmatpush3.bf16.msra.mxu1 %v5388_v28  ;;  %v4421_v35 = vpop.f32.mrf.mxu0  ;;  %4463 = vmatprep.mubr.msk.bf16.mxu1 %vm4815_vm0, %v4814_v4 }
 0x75d   : > { %4486 = vmatprep.subr.bf16.mxu1 %v4814_v4  ;;  %4476 = vmatpush3.msra.mxu0 %v5099_v59  ;;  %v5745_v35 = vld [vmem:[#allocation26_spill] sm:$0xff] }
 0x75e   : > { %v2096_v39 = vpop.f32.mrf.mxu0  ;;  %4477 = vmatprep.subr.mxu0 %v4814_v4 }
 0x75f   : > { %4464 = vmatmul.mubr.msk.bf16.vlgmr.msra.gmra.mxu1 %vm2006_vm6, %v3804_v37  ;;  %4478 = vmatpush3.msra.mxu0 %v5107_v61  ;;  %v5746_v39 = vld [vmem:[#allocation27_spill] sm:$0xff] }
 0x760   : > { %4487 = vmatpush3.bf16.msra.mxu1 %v5388_v28  ;;  %v4422_v46 = vpop.f32.mrf.mxu0  ;;  %4488 = vmatprep.mubr.msk.bf16.mxu1 %vm4815_vm0, %v4814_v4 }
 0x761   : > { %4492 = vmatprep.subr.mxu1 %v4814_v4  ;;  %4479 = vmatprep.subr.mxu0 %v4814_v4 }
 0x762   : > { %4480 = vmatpush3.msra.mxu0 %v5123_v0 }
 0x763   : > { %4481 = vmatprep.subr.mxu0 %v4814_v4 }
 0x764   : > { %4482 = vmatpush3.msra.mxu0 %v5129_v2 }
 0x765   : > { %4511 = vmatprep.subr.bf16.mxu0 %v4814_v4 }
 0x767   : > { %4489 = vmatmul.mubr.msk.bf16.vlgmr.msra.gmra.mxu1 %vm2006_vm6, %v3807_v50  ;;  %v5747_v50 = vld [vmem:[#allocation28_spill] sm:$0xff] }
 0x768   : > { %4493 = vmatpush3.msra.mxu1 %v5069_v47  ;;  %4508 = vmatprep.mubr.msk.f32.mxu1 %vm4815_vm0, %v4814_v4 }
 0x769   : > { %4494 = vmatprep.subr.mxu1 %v4814_v4 }
 0x76a   : > { %4495 = vmatpush3.msra.mxu1 %v5077_v51 }
 0x76b   : > { %4496 = vmatprep.subr.mxu1 %v4814_v4 }
 0x76c   : > { %4497 = vmatpush3.msra.mxu1 %v5085_v55 }
 0x76d   : > { %4498 = vmatprep.subr.mxu1 %v4814_v4 }
 0x76e   : > { %4499 = vmatpush3.msra.mxu1 %v5093_v58 }
 0x76f   : > { %4500 = vmatprep.subr.mxu1 %v4814_v4 }
 0x770   : > { %4501 = vmatpush3.msra.mxu1 %v5101_v60  ;;  %v3810_v60 = vld [vmem:[%s5677_s6 + $0x10] sm:$0xf] }
 0x771   : > { %4502 = vmatprep.subr.mxu1 %v4814_v4 }
 0x772   : > { %4503 = vmatpush3.msra.mxu1 %v5109_v62 }
 0x773   : > { %4504 = vmatprep.subr.mxu1 %v4814_v4 }
 0x774   : > { %4505 = vmatpush3.msra.mxu1 %v5125_v1  ;;  %v3813_v1 = vld [vmem:[%s5677_s6 + $0x14] sm:$0xf] }
 0x775   : > { %4506 = vmatprep.subr.mxu1 %v4814_v4 }
 0x776   : > { %4507 = vmatpush3.msra.mxu1 %v5131_v3 }
 0x777   : > { %4536 = vmatprep.subr.bf16.mxu1 %v4814_v4 }
 0x813   : > { %v2241_v47 = vpop.f32.mrf.mxu0 }
 0x815   : > { %v4460_v51 = vpop.f32.mrf.mxu0 }
 0x816   : > { %v5748_v51 = vld [vmem:[#allocation29_spill] sm:$0xff] }
 0x81b   : > { %v2168_v54 = vpop.f32.mrf.mxu1 }
 0x81c   : > { %v2242_v55 = vadd.f32 %v2241_v47, %v2168_v54  ;;  %v5749_v54 = vld [vmem:[#allocation30_spill] sm:$0xff] }
 0x81d   : > { %v4441_v57 = vpop.f32.mrf.mxu1 }
 0x81e   : > { %v3078_v57 = vld [vmem:[%s5678_s7] sm:$0xff] }
 0x81f   : > { %v2284_v58 = vpop.f32.mrf.mxu1  ;;  %3081 = vperm.xlu1 %4707, %v3078_v57   ;;  %v3219_v57 = vld [vmem:[#allocation4 + $0xa8] sm:$0xff] }
 0x820   : > { %4484 = vmatmul.mubr.msk.f32.vlgmr.msra.gmra.mxu0 %vm935_vm3, %v2284_v58 }
 0x821   : > { %4512 = vmatpush3.bf16.msra.mxu0 %v5388_v28  ;;  %v4465_v59 = vpop.f32.mrf.mxu1  ;;  %4513 = vmatprep.mubr.msk.bf16.mxu0 %vm4815_vm0, %v4814_v4 }
 0x822   : > { %4517 = vmatprep.subr.mxu0 %v4814_v4 }
 0x823   : > { %v2287_v61 = vpop.f32.mrf.mxu1 }
 0x824   : > { %4514 = vmatmul.mubr.msk.bf16.vlgmr.msra.gmra.mxu0 %vm2006_vm6, %v3810_v60 }
 0x825   : > { %v4466_v62 = vpop.f32.mrf.mxu1  ;;  %4518 = vmatpush3.msra.mxu0 %v5155_v16  ;;  %4533 = vmatprep.mubr.msk.f32.mxu0 %vm4815_vm0, %v4814_v4 }
 0x826   : > { %4519 = vmatprep.subr.mxu0 %v4814_v4 }
 0x827   : > { %v2403_v0 = vpop.f32.mrf.mxu1  ;;  %4520 = vmatpush3.msra.mxu0 %v5163_v20 }
 0x828   : > { %4509 = vmatmul.mubr.msk.f32.vlgmr.msra.gmra.mxu1 %vm935_vm3, %v2403_v0  ;;  %4521 = vmatprep.subr.mxu0 %v4814_v4 }
 0x829   : > { %4537 = vmatpush3.bf16.msra.mxu1 %v5388_v28  ;;  %4538 = vmatprep.mubr.msk.bf16.mxu1 %vm4815_vm0, %v4814_v4  ;;  %v4490_v2 = vpop.f32.mrf.mxu1 }
 0x82a   : > { %4522 = vmatpush3.msra.mxu0 %v5171_v41  ;;  %4542 = vmatprep.subr.mxu1 %v4814_v4 }
 0x82b   : > { %4523 = vmatprep.subr.mxu0 %v4814_v4  ;;  %v2406_v3 = vpop.f32.mrf.mxu1 }
 0x82c   : > { %4539 = vmatmul.mubr.msk.bf16.vlgmr.msra.gmra.mxu1 %vm2006_vm6, %v3813_v1  ;;  %4524 = vmatpush3.msra.mxu0 %v5179_v43  ;;  %v3816_v43 = vld [vmem:[%s5677_s6 + $0x18] sm:$0xf] }
 0x82d   : > { %4525 = vmatprep.subr.mxu0 %v4814_v4  ;;  %4543 = vmatpush3.msra.mxu1 %v5157_v17  ;;  %v4491_v16 = vpop.f32.mrf.mxu1 }
 0x82e   : > { %4526 = vmatpush3.msra.mxu0 %v5187_v45  ;;  %4544 = vmatprep.subr.mxu1 %v4814_v4 }
 0x82f   : > { %4527 = vmatprep.subr.mxu0 %v4814_v4  ;;  %4545 = vmatpush3.msra.mxu1 %v5165_v22 }
 0x830   : > { %4528 = vmatpush3.msra.mxu0 %v5195_v49  ;;  %4546 = vmatprep.subr.mxu1 %v4814_v4 }
 0x831   : > { %4529 = vmatprep.subr.mxu0 %v4814_v4  ;;  %4547 = vmatpush3.msra.mxu1 %v5173_v42 }
 0x832   : > { %4530 = vmatpush3.msra.mxu0 %v5211_v53  ;;  %4548 = vmatprep.subr.mxu1 %v4814_v4 }
 0x833   : > { %4531 = vmatprep.subr.mxu0 %v4814_v4  ;;  %4549 = vmatpush3.msra.mxu1 %v5181_v44 }
 0x834   : > { %4532 = vmatpush3.msra.mxu0 %v5219_v6  ;;  %4550 = vmatprep.subr.mxu1 %v4814_v4 }
 0x835   : > { %4561 = vmatprep.subr.bf16.mxu0 %v4814_v4  ;;  %4551 = vmatpush3.msra.mxu1 %v5189_v48 }
 0x836   : > { %4552 = vmatprep.subr.mxu1 %v4814_v4  ;;  %4558 = vmatprep.mubr.msk.f32.mxu1 %vm4815_vm0, %v4814_v4 }
 0x837   : > { %4553 = vmatpush3.msra.mxu1 %v5197_v52 }
 0x838   : > { %4554 = vmatprep.subr.mxu1 %v4814_v4 }
 0x839   : > { %4555 = vmatpush3.msra.mxu1 %v5213_v5  ;;  %v3819_v5 = vld [vmem:[%s5677_s6 + $0x1c] sm:$0xf] }
 0x83a   : > { %4556 = vmatprep.subr.mxu1 %v4814_v4 }
 0x83b   : > { %4557 = vmatpush3.msra.mxu1 %v5221_v8 }
 0x83c   : > { %4586 = vmatprep.subr.bf16.mxu1 %v4814_v4 }
 0x8e0   : > { %v2359_v17 = vpop.f32.mrf.mxu0 }
 0x8e1   : > { %v2363_v20 = vadd.f32 %v2359_v17, %v2242_v55  ;;  %v5750_v55 = vld [vmem:[#allocation31_spill] sm:$0xff] }
 0x8e2   : > { %v4485_v22 = vpop.f32.mrf.mxu0 }
 0x8e4   : > { %v2522_v41 = vpop.f32.mrf.mxu0 }
 0x8e5   : > { %4534 = vmatmul.mubr.msk.f32.vlgmr.msra.gmra.mxu0 %vm935_vm3, %v2522_v41 }
 0x8e6   : > { %4562 = vmatpush3.bf16.msra.mxu0 %v5388_v28  ;;  %v4515_v42 = vpop.f32.mrf.mxu0  ;;  %4563 = vmatprep.mubr.msk.bf16.mxu0 %vm4815_vm0, %v4814_v4 }
 0x8e7   : > { %4567 = vmatprep.subr.mxu0 %v4814_v4 }
 0x8e8   : > { %v2478_v44 = vpop.f32.mrf.mxu1  ;;  %v2525_v45 = vpop.f32.mrf.mxu0 }
 0x8e9   : > { %v2482_v48 = vadd.f32 %v2478_v44, %v2363_v20  ;;  %4564 = vmatmul.mubr.msk.bf16.vlgmr.msra.gmra.mxu0 %vm2006_vm6, %v3816_v43  ;;  %v3082_v20 = vpop.permute.xlu1 %3081 }
 0x8ea   : > { %v4510_v49 = vpop.f32.mrf.mxu1  ;;  %v4516_v52 = vpop.f32.mrf.mxu0  ;;  %4568 = vmatpush3.msra.mxu0 %v5244_v9  ;;  %4583 = vmatprep.mubr.msk.f32.mxu0 %vm4815_vm0, %v4814_v4  ;;  %v5730_v9 = vld [vmem:[#allocation14_spill] sm:$0xff] }
 0x8eb   : > { %4569 = vmatprep.subr.mxu0 %v4814_v4  ;;  %v3229_v49 = vld [vmem:[#allocation4 + $0xf8] sm:$0xff]  ;;  %v3228_v52 = vld [vmem:[#allocation4 + $0xf0] sm:$0xff] }
 0x8ec   : > { %v2641_v53 = vpop.f32.mrf.mxu1  ;;  %4570 = vmatpush3.msra.mxu0 %v5252_v13  ;;  %v5731_v13 = vld [vmem:[#allocation11_spill] sm:$0xff] }
 0x8ed   : > { %4559 = vmatmul.mubr.msk.f32.vlgmr.msra.gmra.mxu1 %vm935_vm3, %v2641_v53  ;;  %4571 = vmatprep.subr.mxu0 %v4814_v4  ;;  %v3227_v53 = vld [vmem:[#allocation4 + $0xe8] sm:$0xff] }
 0x8ee   : > { %4587 = vmatpush3.bf16.msra.mxu1 %v5388_v28  ;;  %4588 = vmatprep.mubr.msk.bf16.mxu1 %vm4815_vm0, %v4814_v4  ;;  %v4540_v6 = vpop.f32.mrf.mxu1 }
 0x8ef   : > { %4572 = vmatpush3.msra.mxu0 %v5259_v40  ;;  %4592 = vmatprep.subr.mxu1 %v4814_v4  ;;  %v5733_v40 = vld [vmem:[#allocation12_spill] sm:$0xff] }
 0x8f0   : > { %4573 = vmatprep.subr.mxu0 %v4814_v4  ;;  %v2644_v8 = vpop.f32.mrf.mxu1  ;;  %v3225_v6 = vld [vmem:[#allocation4 + $0xd8] sm:$0xff] }
 0x8f1   : > { %4589 = vmatmul.mubr.msk.bf16.vlgmr.msra.gmra.mxu1 %vm2006_vm6, %v3819_v5  ;;  %4574 = vmatpush3.msra.mxu0 %v5730_v9  ;;  %v3226_v5 = vld [vmem:[#allocation4 + $0xe0] sm:$0xff]  ;;  %v3224_v8 = vld [vmem:[#allocation4 + $0xd0] sm:$0xff]  ;;  %v3223_v9 = vld [vmem:[#allocation4 + $0xc8] sm:$0xff] }
 0x8f2   : > { %4575 = vmatprep.subr.mxu0 %v4814_v4  ;;  %4593 = vmatpush3.msra.mxu1 %v5731_v13  ;;  %v4541_v32 = vpop.f32.mrf.mxu1  ;;  %v3222_v13 = vld [vmem:[#allocation4 + $0xc0] sm:$0xff] }
 0x8f3   : > { %4576 = vmatpush3.msra.mxu0 %v5732_v21  ;;  %4594 = vmatprep.subr.mxu1 %v4814_v4 }
 0x8f4   : > { %4577 = vmatprep.subr.mxu0 %v4814_v4  ;;  %4595 = vmatpush3.msra.mxu1 %v5733_v40 }
 0x8f5   : > { %4578 = vmatpush3.msra.mxu0 %v5734_v34  ;;  %4596 = vmatprep.subr.mxu1 %v4814_v4 }
 0x8f6   : > { %4579 = vmatprep.subr.mxu0 %v4814_v4  ;;  %4597 = vmatpush3.msra.mxu1 %v5735_v7 }
 0x8f7   : > { %4580 = vmatpush3.msra.mxu0 %v5736_v36  ;;  %4598 = vmatprep.subr.mxu1 %v4814_v4 }
 0x8f8   : > { %4581 = vmatprep.subr.mxu0 %v4814_v4  ;;  %4599 = vmatpush3.msra.mxu1 %v5737_v18 }
 0x8f9   : > { %4582 = vmatpush3.msra.mxu0 %v5738_v19  ;;  %4600 = vmatprep.subr.mxu1 %v4814_v4 }
 0x8fa   : > { %4611 = vmatprep.subr.bf16.mxu0 %v4814_v4  ;;  %4601 = vmatpush3.msra.mxu1 %v5739_v56 }
 0x8fb   : > { %4602 = vmatprep.subr.mxu1 %v4814_v4  ;;  %4608 = vmatprep.mubr.msk.f32.mxu1 %vm4815_vm0, %v4814_v4 }
 0x8fc   : > { %4603 = vmatpush3.msra.mxu1 %v5740_v38 }
 0x8fd   : > { %4604 = vmatprep.subr.mxu1 %v4814_v4 }
 0x8fe   : > { %4605 = vmatpush3.msra.mxu1 %v5741_v14 }
 0x8ff   : > { %4606 = vmatprep.subr.mxu1 %v4814_v4 }
 0x900   : > { %4607 = vmatpush3.msra.mxu1 %v5742_v10 }
 0x901   : > { %4636 = vmatprep.subr.bf16.mxu1 %v4814_v4 }
 0x9a5   : > { %v2597_v15 = vpop.f32.mrf.mxu0 }
 0x9a6   : > { %v2601_v23 = vadd.f32 %v2597_v15, %v2482_v48  ;;  %v3654_v48 = vld [vmem:[%s5680_s9] sm:$0xf] }
 0x9a7   : > { %v4535_v11 = vpop.f32.mrf.mxu0 }
 0x9a9   : > { %v2760_v12 = vpop.f32.mrf.mxu0 }
 0x9aa   : > { %4584 = vmatmul.mubr.msk.f32.vlgmr.msra.gmra.mxu0 %vm935_vm3, %v2760_v12  ;;  %v3105_v12 = vld [vmem:[%s5679_s8] sm:$0x3] }
 0x9ab   : > { %4612 = vmatpush3.bf16.msra.mxu0 %v5388_v28  ;;  %v4565_v24 = vpop.f32.mrf.mxu0  ;;  %4613 = vmatprep.mubr.msk.bf16.mxu0 %vm4815_vm0, %v4814_v4 }
 0x9ac   : > { %4617 = vmatprep.subr.mxu0 %v4814_v4  ;;  %v3167_v24 = vld [vmem:[#allocation4 + $0x78] sm:$0xff] }
 0x9ad   : > { %v2716_v30 = vpop.f32.mrf.mxu1  ;;  %v2763_v63 = vpop.f32.mrf.mxu0 }
 0x9ae   : > { %v2720_v25 = vadd.f32 %v2716_v30, %v2601_v23  ;;  %4614 = vmatmul.mubr.msk.bf16.vlgmr.msra.gmra.mxu0 %vm2006_vm6, %v3822_v26  ;;  %v3826_v26 = vld [vmem:[%s5679_s8 + $0x2] sm:$0x3]  ;;  %v3166_v30 = vld [vmem:[#allocation4 + $0x70] sm:$0xff]  ;;  %v3165_v63 = vld [vmem:[#allocation4 + $0x68] sm:$0xff] }
 0x9af   : > { %v4560_v27 = vpop.f32.mrf.mxu1  ;;  %v4566_v29 = vpop.f32.mrf.mxu0  ;;  %4618 = vmatpush3.msra.mxu0 %v5743_v31  ;;  %4633 = vmatprep.mubr.msk.f32.mxu0 %vm4815_vm0, %v4814_v4  ;;  %v3161_v31 = vld [vmem:[#allocation4 + $0x48] sm:$0xff] }
 0x9b0   : > { %4619 = vmatprep.subr.mxu0 %v4814_v4  ;;  %v3163_v27 = vld [vmem:[#allocation4 + $0x58] sm:$0xff]  ;;  %v3162_v29 = vld [vmem:[#allocation4 + $0x50] sm:$0xff] }
 0x9b1   : > { %v2879_v28 = vpop.f32.mrf.mxu1  ;;  %4620 = vmatpush3.msra.mxu0 %v5744_v33  ;;  %v3159_v33 = vld [vmem:[#allocation4 + $0x38] sm:$0xff] }
 0x9b2   : > { %4609 = vmatmul.mubr.msk.f32.vlgmr.msra.gmra.mxu1 %vm935_vm3, %v2879_v28  ;;  %4621 = vmatprep.subr.mxu0 %v4814_v4  ;;  %v3160_v28 = vld [vmem:[#allocation4 + $0x40] sm:$0xff] }
 0x9b3   : > { %4622 = vmatpush3.msra.mxu0 %v5745_v35  ;;  %v4590_v37 = vpop.f32.mrf.mxu1  ;;  %4638 = vmatprep.mubr.msk.bf16.mxu1 %vm4815_vm0, %v4814_v4  ;;  %v3158_v35 = vld [vmem:[#allocation4 + $0x30] sm:$0xff] }
 0x9b4   : > { %4623 = vmatprep.subr.mxu0 %v4814_v4  ;;  %v3157_v37 = vld [vmem:[#allocation4 + $0x28] sm:$0xff] }
 0x9b5   : > { %4624 = vmatpush3.msra.mxu0 %v5746_v39  ;;  %v2882_v46 = vpop.f32.mrf.mxu1  ;;  %v3156_v39 = vld [vmem:[#allocation4 + $0x20] sm:$0xff] }
 0x9b6   : > { %4625 = vmatprep.subr.mxu0 %v4814_v4  ;;  %v3155_v46 = vld [vmem:[#allocation4 + $0x18] sm:$0xff] }
 0x9b7   : > { %4626 = vmatpush3.msra.mxu0 %v5747_v50  ;;  %v4591_v47 = vpop.f32.mrf.mxu1  ;;  %v3154_v50 = vld [vmem:[#allocation4 + $0x10] sm:$0xff] }
 0x9b8   : > { %4627 = vmatprep.subr.mxu0 %v4814_v4  ;;  %v3153_v47 = vld [vmem:[#allocation4 + $0x8] sm:$0xff] }
 0x9b9   : > { %4628 = vmatpush3.msra.mxu0 %v5748_v51  ;;  %v3221_v51 = vld [vmem:[#allocation4 + $0xb8] sm:$0xff] }
 0x9ba   : > { %4629 = vmatprep.subr.mxu0 %v4814_v4 }
 0x9bb   : > { %4630 = vmatpush3.msra.mxu0 %v5749_v54  ;;  %v3152_v54 = vld [vmem:[#allocation4] sm:$0xff] }
 0x9bc   : > { %4631 = vmatprep.subr.mxu0 %v4814_v4 }
 0x9bd   : > { %4632 = vmatpush3.msra.mxu0 %v5750_v55  ;;  %v3220_v55 = vld [vmem:[#allocation4 + $0xb0] sm:$0xff] }
 0x9be   : > { %3249 = vmatprep.subr.mxu0 %v3229_v49  ;;  %v3435_v49 = vld [vmem:[#allocation4 + $0x158] sm:$0xff] }
 0xa6a   : > { %v2835_v58 = vpop.f32.mrf.mxu0 }
 0xa6b   : > { %v2839_v59 = vadd.f32 %v2835_v58, %v2720_v25  ;;  %v3164_v25 = vld [vmem:[#allocation4 + $0x60] sm:$0xff] }
 0xa6c   : > { %v4585_v60 = vpop.f32.mrf.mxu0  ;;  %v3218_v58 = vld [vmem:[#allocation4 + $0xa0] sm:$0xff] }
 0xa6d   : > { %v3216_v60 = vld [vmem:[#allocation4 + $0x90] sm:$0xff] }
 0xa6e   : > { %v2998_v61 = vpop.f32.mrf.mxu0 }
 0xa6f   : > { %4634 = vmatmul.mubr.msk.f32.vlgmr.msra.gmra.mxu0 %vm935_vm3, %v2998_v61  ;;  %v3215_v61 = vld [vmem:[#allocation4 + $0x88] sm:$0xff] }
 0xa70   : > { %v4615_v62 = vpop.f32.mrf.mxu0  ;;  %3297 = vmatprep.mubr.f32.mxu0 %v4814_v4  ;;  %3250 = vmatpush1.msra.mxu0 %v3228_v52  ;;  %v3434_v52 = vld [vmem:[#allocation4 + $0x150] sm:$0xff] }
 0xa71   : > { %3251 = vmatprep.subr.mxu0 %v3227_v53  ;;  %v3214_v62 = vld [vmem:[#allocation4 + $0x80] sm:$0xff]  ;;  %v3433_v53 = vld [vmem:[#allocation4 + $0x148] sm:$0xff] }
 0xa72   : > { %v2954_v0 = vpop.f32.mrf.mxu1  ;;  %v3001_v1 = vpop.f32.mrf.mxu0  ;;  %3252 = vmatpush1.msra.mxu0 %v3226_v5  ;;  %v3432_v5 = vld [vmem:[#allocation4 + $0x140] sm:$0xff] }
 0xa73   : > { %v2958_v2 = vadd.f32 %v2954_v0, %v2839_v59  ;;  %3253 = vmatprep.subr.mxu0 %v3225_v6  ;;  %v3217_v59 = vld [vmem:[#allocation4 + $0x98] sm:$0xff]  ;;  %v3438_v1 = vld [vmem:[#allocation4 + $0x170] sm:$0xff] }
 0xa74   : > { %v4616_v3 = vpop.f32.mrf.mxu0  ;;  %v4610_v16 = vpop.f32.mrf.mxu1  ;;  %3254 = vmatpush1.msra.mxu0 %v3224_v8  ;;  %v3439_v0 = vld [vmem:[#allocation4 + $0x178] sm:$0xff] }
 0xa75   : > { %3255 = vmatprep.subr.mxu0 %v3223_v9  ;;  %v3437_v3 = vld [vmem:[#allocation4 + $0x168] sm:$0xff]  ;;  %v3431_v6 = vld [vmem:[#allocation4 + $0x138] sm:$0xff]  ;;  %v3430_v9 = vld [vmem:[#allocation4 + $0x130] sm:$0xff] }
 0xa76   : > { %3256 = vmatpush1.msra.mxu0 %v3222_v13  ;;  %v3577_v8 = vld [vmem:[#allocation4 + $0x1f8] sm:$0xff]  ;;  %v3576_v13 = vld [vmem:[#allocation4 + $0x1f0] sm:$0xff] }
 0xa77   : > { %3257 = vmatprep.subr.mxu0 %v3221_v51 }
 0xa78   : > { %3258 = vmatpush1.msra.mxu0 %v3220_v55 }
 0xa79   : > { %3259 = vmatprep.subr.mxu0 %v3219_v57 }
 0xa7a   : > { %3260 = vmatpush1.msra.mxu0 %v3218_v58 }
 0xa7b   : > { %3261 = vmatprep.subr.mxu0 %v3217_v59 }
 0xa7c   : > { %3262 = vmatpush1.msra.mxu0 %v3216_v60 }
 0xa7d   : > { %3263 = vmatprep.subr.mxu0 %v3215_v61 }
 0xa7e   : > { %3264 = vmatpush1.msra.mxu0 %v3214_v62 }
 0xa7f   : > { %4648 = vmatprep.subr.bf16.mxu0 %v4814_v4 }
 0xb2f   : > { %v3073_v17 = vpop.f32.mrf.mxu0 }
 0xb30   : > { %v3077_v22 = vadd.f32 %v3073_v17, %v2958_v2 }
 0xb31   : > { %v4635_v41 = vpop.f32.mrf.mxu0 }
 0xb32   : > { %v3084_v42 = vadd.f32 %v3082_v20, %v3077_v22 }
 0xb34   : > { %v3085_v43 = vsel %vm935_vm3, %v3084_v42, 0.0  ;;  %v3088_v44 = vmul.f32 %v3084_v42, %v3084_v42 }
 0xb35   : > { %3086 = vadd.xlane.f32.xlu1 %v3085_v43 }
 0xb36   : > { %v3089_v45 = vsel %vm935_vm3, %v3088_v44, 0.0 }
 0xb37   : > { %3090 = vadd.xlane.f32.xlu0 %v3089_v45  ;;  %v3833_v45 = vld [vmem:[%s5679_s8 + $0x6] sm:$0x3] }
 0xb4d   : > { %3657 = vperm.xlu0 %4706, %v3654_v48   ;;  %v3436_v48 = vld [vmem:[#allocation4 + $0x160] sm:$0xff] }
 0xbbe   : > { %v3087_v32 = vpop.xlane.xlu1 %3086 }
 0xbbf   : > { %v3092_v21 = vmul.f32 0.015625, %v3087_v32  ;;  %v3575_v32 = vld [vmem:[#allocation4 + $0x1e8] sm:$0xff] }
 0xbc0   : > { %v3091_v40 = vpop.xlane.xlu0 %3090 }
 0xbc1   : > { %v3094_v34 = vmul.f32 %v3092_v21, %v3092_v21  ;;  %v3093_v7 = vmul.f32 0.015625, %v3091_v40  ;;  %v3097_v56 = vsub.f32 %v3084_v42, %v3092_v21  ;;  %v3830_v42 = vld [vmem:[%s5679_s8 + $0x4] sm:$0x3]  ;;  %v3429_v21 = vld [vmem:[#allocation4 + $0x128] sm:$0xff] }
 0xbc2   : > { %v3574_v40 = vld [vmem:[#allocation4 + $0x1e0] sm:$0xff] }
 0xbc3   : > { %v3095_v36 = vsub.f32 %v3093_v7, %v3094_v34  ;;  %v3427_v34 = vld [vmem:[#allocation4 + $0x118] sm:$0xff] }
 0xbc4   : > { %v3573_v7 = vld [vmem:[#allocation4 + $0x1d8] sm:$0xff] }
 0xbc5   : > { %v3096_v18 = vmax.f32 %v3095_v36, 0.0  ;;  %v3426_v36 = vld [vmem:[#allocation4 + $0x110] sm:$0xff] }
 0xbc7   : > { %v3098_v19 = vadd.f32 1e-05, %v3096_v18  ;;  %v3572_v18 = vld [vmem:[#allocation4 + $0x1d0] sm:$0xff] }
 0xbc9   : > { %4711 = vrsqrt.f32 %v3098_v19  ;;  %v3425_v19 = vld [vmem:[#allocation4 + $0x108] sm:$0xff] }
 0xbd6   : > { %v4712_v38 = vpop.eup %4711 }
 0xbd7   : > { %v3100_v14 = vmul.f32 %v4712_v38, %v3097_v56  ;;  %v3571_v56 = vld [vmem:[#allocation4 + $0x1c8] sm:$0xff]  ;;  %v3424_v38 = vld [vmem:[#allocation4 + $0x100] sm:$0xff] }
 0xbd9   : > { %vm3101_vm7 = vcmp.ge.f32.partialorder %v3100_v14, 0.0  ;;  %v3102_v10 = vmul.f32 0.01, %v3100_v14 }
 0xbdb   : > { %v3103_v15 = vsel %vm3101_vm7, %v3100_v14, %v3102_v10  ;;  %v3570_v14 = vld [vmem:[#allocation4 + $0x1c0] sm:$0xff]  ;;  %v3569_v10 = vld [vmem:[#allocation4 + $0x1b8] sm:$0xff] }
 0xbdc   : > { %v3104_v23 = vpack.c.bf16 %v3103_v15, %v3103_v15  ;;  %v3568_v15 = vld [vmem:[#allocation4 + $0x1b0] sm:$0xff] }
 0xbde   : > { %v5624_v11 = vsel %vm2010_vm5, %v3104_v23, 0  ;;  %v3567_v23 = vld [vmem:[#allocation4 + $0x1a8] sm:$0xff] }
 0xbdf   : > { %4637 = vmatpush3.bf16.msra.mxu1 %v5624_v11 }
 0xbe0   : > { %4642 = vmatprep.subr.bf16.mxu1 %v4814_v4 }
 0xbe2   : > { %4639 = vmatmul.mubr.msk.bf16.vlgmr.msra.gmra.mxu1 %vm2006_vm6, %v3105_v12  ;;  %v3565_v12 = vld [vmem:[#allocation4 + $0x198] sm:$0xff] }
 0xbe3   : > { %4643 = vmatpush3.bf16.msra.mxu1 %v5624_v11  ;;  %4644 = vmatprep.mubr.msk.bf16.mxu1 %vm4815_vm0, %v4814_v4 }
 0xbe4   : > { %3323 = vmatprep.subr.mxu1 %v3167_v24  ;;  %v3564_v24 = vld [vmem:[#allocation4 + $0x190] sm:$0xff] }
 0xbea   : > { %4645 = vmatmul.mubr.msk.bf16.vlgmr.msra.gmra.mxu1 %vm2006_vm6, %v3826_v26  ;;  %v3563_v26 = vld [vmem:[#allocation4 + $0x188] sm:$0xff] }
 0xbeb   : > { %3324 = vmatpush1.msra.mxu1 %v3166_v30  ;;  %3371 = vmatprep.mubr.f32.mxu1 %v4814_v4  ;;  %v3562_v30 = vld [vmem:[#allocation4 + $0x180] sm:$0xff] }
 0xbec   : > { %3325 = vmatprep.subr.mxu1 %v3165_v63 }
 0xbed   : > { %3326 = vmatpush1.msra.mxu1 %v3164_v25 }
 0xbee   : > { %3327 = vmatprep.subr.mxu1 %v3163_v27 }
 0xbef   : > { %3328 = vmatpush1.msra.mxu1 %v3162_v29 }
 0xbf0   : > { %3329 = vmatprep.subr.mxu1 %v3161_v31 }
 0xbf1   : > { %3330 = vmatpush1.msra.mxu1 %v3160_v28 }
 0xbf2   : > { %3331 = vmatprep.subr.mxu1 %v3159_v33 }
 0xbf3   : > { %3332 = vmatpush1.msra.mxu1 %v3158_v35 }
 0xbf4   : > { %3333 = vmatprep.subr.mxu1 %v3157_v37 }
 0xbf5   : > { %3334 = vmatpush1.msra.mxu1 %v3156_v39 }
 0xbf6   : > { %3335 = vmatprep.subr.mxu1 %v3155_v46  ;;  %v5751_v46 = vld [vmem:[#allocation9_spill] sm:$0xff] }
 0xbf7   : > { %3336 = vmatpush1.msra.mxu1 %v3154_v50  ;;  %3662 = vst [vmem:[%s403_s21] sm:$0xf] %v5751_v46  ;;  %v5752_v50 = vld [vmem:[#allocation10_spill] sm:$0xff] }
 0xbf8   : > { %3337 = vmatprep.subr.mxu1 %v3153_v47  ;;  %3663 = vst [vmem:[%s403_s21 + $0x8] sm:$0xf] %v5752_v50 }
 0xbf9   : > { %3338 = vmatpush1.msra.mxu1 %v3152_v54 }
 0xbfa   : > { %3459 = vmatprep.subr.mxu1 %v3439_v0  ;;  %v3658_v0 = vpop.permute.xlu0 %3657 }
 0xca2   : > { %v3146_v2 = vpop.f32.mrf.mxu1 }
 0xca3   : > { %3829 = vmatmul.mubr.msk.f32.vlgmr.msra.gmra.mxu1 %vm935_vm3, %v3146_v2 }
 0xca4   : > { %v4640_v16 = vpop.f32.mrf.mxu1  ;;  %3460 = vmatpush1.msra.mxu1 %v3438_v1  ;;  %3507 = vmatprep.mubr.f32.mxu1 %v4814_v4 }
 0xca5   : > { %3461 = vmatprep.subr.mxu1 %v3437_v3 }
 0xca6   : > { %v3149_v17 = vpop.f32.mrf.mxu1  ;;  %3462 = vmatpush1.msra.mxu1 %v3436_v48 }
 0xca7   : > { %3463 = vmatprep.subr.mxu1 %v3435_v49 }
 0xca8   : > { %v4641_v20 = vpop.f32.mrf.mxu1  ;;  %3464 = vmatpush1.msra.mxu1 %v3434_v52 }
 0xca9   : > { %3465 = vmatprep.subr.mxu1 %v3433_v53 }
 0xcaa   : > { %v3207_v22 = vpop.f32.mrf.mxu1  ;;  %3466 = vmatpush1.msra.mxu1 %v3432_v5 }
 0xcab   : > { %3828 = vmatmul.mubr.msk.f32.vlgmr.msra.gmra.mxu0 %vm935_vm3, %v3207_v22  ;;  %3467 = vmatprep.subr.mxu1 %v3431_v6 }
 0xcac   : > { %4649 = vmatpush3.bf16.msra.mxu0 %v5624_v11  ;;  %v4646_v41 = vpop.f32.mrf.mxu1  ;;  %4650 = vmatprep.mubr.msk.bf16.mxu0 %vm4815_vm0, %v4814_v4 }
 0xcad   : > { %4654 = vmatprep.subr.bf16.mxu0 %v4814_v4  ;;  %3468 = vmatpush1.msra.mxu1 %v3430_v9 }
 0xcae   : > { %v3210_v43 = vpop.f32.mrf.mxu1  ;;  %3469 = vmatprep.subr.mxu1 %v3429_v21 }
 0xcaf   : > { %4651 = vmatmul.mubr.msk.bf16.vlgmr.msra.gmra.mxu0 %vm2006_vm6, %v3830_v42 }
 0xcb0   : > { %4655 = vmatpush3.bf16.msra.mxu0 %v5624_v11  ;;  %v4647_v44 = vpop.f32.mrf.mxu1  ;;  %4656 = vmatprep.mubr.msk.bf16.mxu0 %vm4815_vm0, %v4814_v4  ;;  %v3566_v11 = vld [vmem:[#allocation4 + $0x1a0] sm:$0xff] }
 0xcb1   : > { %3597 = vmatprep.subr.mxu0 %v3577_v8 }
 0xcb7   : > { %4657 = vmatmul.mubr.msk.bf16.vlgmr.msra.gmra.mxu0 %vm2006_vm6, %v3833_v45 }
 0xcb8   : > { %3645 = vmatprep.mubr.f32.mxu0 %v4814_v4  ;;  %3598 = vmatpush1.msra.mxu0 %v3576_v13  ;;  %v3428_v4 = vld [vmem:[#allocation4 + $0x120] sm:$0xff] }
 0xcb9   : > { %3599 = vmatprep.subr.mxu0 %v3575_v32  ;;  %3470 = vmatpush1.msra.mxu1 %v3428_v4 }
 0xcba   : > { %3600 = vmatpush1.msra.mxu0 %v3574_v40  ;;  %3471 = vmatprep.subr.mxu1 %v3427_v34 }
 0xcbb   : > { %3601 = vmatprep.subr.mxu0 %v3573_v7  ;;  %3472 = vmatpush1.msra.mxu1 %v3426_v36 }
 0xcbc   : > { %3602 = vmatpush1.msra.mxu0 %v3572_v18  ;;  %3473 = vmatprep.subr.mxu1 %v3425_v19 }
 0xcbd   : > { %3603 = vmatprep.subr.mxu0 %v3571_v56  ;;  %3474 = vmatpush1.msra.mxu1 %v3424_v38 }
 0xcbe   : > { %3604 = vmatpush1.msra.mxu0 %v3570_v14 }
 0xcbf   : > { %3605 = vmatprep.subr.mxu0 %v3569_v10 }
 0xcc0   : > { %3606 = vmatpush1.msra.mxu0 %v3568_v15 }
 0xcc1   : > { %3607 = vmatprep.subr.mxu0 %v3567_v23 }
 0xcc2   : > { %3608 = vmatpush1.msra.mxu0 %v3566_v11 }
 0xcc3   : > { %3609 = vmatprep.subr.mxu0 %v3565_v12 }
 0xcc4   : > { %3610 = vmatpush1.msra.mxu0 %v3564_v24 }
 0xcc5   : > { %3611 = vmatprep.subr.mxu0 %v3563_v26 }
 0xcc6   : > { %3612 = vmatpush1.msra.mxu0 %v3562_v30 }
 0xd63   : > { %v3373_v47 = vpop.f32.mrf.mxu1 }
 0xd65   : > { %v3375_v51 = vpop.f32.mrf.mxu1 }
 0xd6b   : > { %v3299_v63 = vpop.f32.mrf.mxu0 }
 0xd6c   : > { %v3374_v55 = vadd.f32 %v3373_v47, %v3299_v63 }
 0xd6d   : > { %v3301_v25 = vpop.f32.mrf.mxu0 }
 0xd6e   : > { %v3376_v58 = vadd.f32 %v3375_v51, %v3301_v25 }
 0xd6f   : > { %v3417_v27 = vpop.f32.mrf.mxu0 }
 0xd70   : > { %3832 = vmatmul.mubr.msk.f32.vlgmr.msra.gmra.mxu1 %vm935_vm3, %v3417_v27 }
 0xd71   : > { %v4652_v29 = vpop.f32.mrf.mxu0 }
 0xd73   : > { %v3420_v31 = vpop.f32.mrf.mxu0 }
 0xd75   : > { %v4653_v28 = vpop.f32.mrf.mxu0 }
 0xd77   : > { %v3555_v33 = vpop.f32.mrf.mxu0 }
 0xd78   : > { %3835 = vmatmul.mubr.msk.f32.vlgmr.msra.gmra.mxu0 %vm935_vm3, %v3555_v33 }
 0xd79   : > { %v4658_v35 = vpop.f32.mrf.mxu0 }
 0xd7b   : > { %v3558_v37 = vpop.f32.mrf.mxu0 }
 0xd7d   : > { %v4659_v39 = vpop.f32.mrf.mxu0 }
 0xe30   : > { %v3509_v54 = vpop.f32.mrf.mxu1 }
 0xe31   : > { %v3514_v59 = vadd.f32 %v3509_v54, %v3374_v55 }
 0xe32   : > { %v3511_v57 = vpop.f32.mrf.mxu1 }
 0xe33   : > { %v3515_v61 = vadd.f32 %v3511_v57, %v3376_v58 }
 0xe38   : > { %v3647_v60 = vpop.f32.mrf.mxu0 }
 0xe39   : > { %v3652_v62 = vadd.f32 %v3647_v60, %v3514_v59 }
 0xe3a   : > { %v3649_v1 = vpop.f32.mrf.mxu0 }
 0xe3b   : > { %v3660_v2 = vadd.f32 %v3658_v0, %v3652_v62  ;;  %v3653_v3 = vadd.f32 %v3649_v1, %v3515_v61 }
 0xe3d   : > { %v3666_v16 = vrot.slane %v3660_v2, 4  ;;  %v3661_v17 = vadd.f32 %v3658_v0, %v3653_v3 }
 0xe3f   : > { %3670 = vst [vmem:[%s403_s21] sm:$0xf0] %v3666_v16  ;;  %v3667_v20 = vrot.slane %v3661_v17, 4 }
 0xe41   : > { %3671 = vst [vmem:[%s403_s21 + $0x8] sm:$0xf0] %v3667_v20 }
 0xe42 PF: > { %s22_s13 = sadd.s32 1, %s4805_s13  }
 0xe43   : > { %p19_p3 = scmp.ge.s32.totalorder %s22_s13, 4  }
 0xe45   :  { %21 = sbr.rel (!%p19_p3) target bundleno = 2 (0x2), region = 136 }
 0xe4a   :  { %3693 = vsyncpa [#allocation3], 1 }
 0xe4b   :  { %3695 = vsyncpa [#allocation3 + $0x1], 1 }
 0xe4c   :  { %3696 = vsyncpa [#allocation5], 1 }

</bundles_post_ra>
